<compile_context>
chip_gen: v7x
topology: tpu7x:2x2x1
jax: 0.10.0
libtpu: 0.0.40
codegen_flags: <defaults>
</compile_context>

<pallas_src>
import functools

import jax
import jax.numpy as jnp
from jax import lax
from jax.experimental import pallas as pl
from jax.experimental.pallas import tpu as pltpu


# ----------------------------------------------------------------------------
# Fused forward kernel
# ----------------------------------------------------------------------------
def _fused_physics_vae_kernel(
    # graph topology (int32)
    send_col_ref, recv_col_ref, recv_row_ref,
    # data
    xy_ref, x_ref, eps_n_ref, eps_e_ref, eps_g_ref,
    # encoder params
    enc_node_w_ref, enc_node_b_ref,
    enc_edge_w_src_ref, enc_edge_w_dst_ref, enc_edge_b_ref,
    enc_glob_w_ref, enc_glob_b_ref,
    head_node_w_ref, head_node_b_ref,
    head_edge_w_ref, head_edge_b_ref,
    head_glob_w_ref, head_glob_b_ref,
    # decoder params (weights split by input block -> no concat needed)
    de1_w_src_ref, de1_w_dst_ref, de1_w_ze_ref, de1_w_zg_ref, de1_b_ref,
    de2_w_ref, de2_b_ref,
    dn1_w_x_ref, dn1_w_agg_ref, dn1_w_zn_ref, dn1_w_zg_ref, dn1_b_ref,
    dn2_w_ref, dn2_b_ref,
    # outputs
    pred_ref, znmu_ref, znlv_ref, zemu_ref, zelv_ref, zgmu_ref, zglv_ref,
    *, z_dim,
):
    f32 = jnp.float32
    n_nodes = x_ref.shape[0]
    n_edges = send_col_ref.shape[0]

    def dot(a, b):
        return jnp.dot(a, b, preferred_element_type=f32)

    # ---- gather / scatter matrices built in-register from the edge indices ----
    node_ids_lane = lax.broadcasted_iota(jnp.int32, (n_edges, n_nodes), 1)
    send_oh = (node_ids_lane == send_col_ref[...]).astype(f32)     # [E, N]
    recv_oh = (node_ids_lane == recv_col_ref[...]).astype(f32)     # [E, N]
    node_ids_sub = lax.broadcasted_iota(jnp.int32, (n_nodes, n_edges), 0)
    recv_oh_t = (node_ids_sub == recv_row_ref[...]).astype(f32)    # [N, E]

    # ---------------- encoder (GNN recognition net, hidden=32) ----------------
    h_node = jnp.maximum(
        dot(xy_ref[...], enc_node_w_ref[...]) + enc_node_b_ref[...], 0.0)   # [N,H]
    h_src = dot(send_oh, h_node)                                            # [E,H]
    h_dst = dot(recv_oh, h_node)                                            # [E,H]
    h_edge = jnp.maximum(
        dot(h_src, enc_edge_w_src_ref[...])
        + dot(h_dst, enc_edge_w_dst_ref[...])
        + enc_edge_b_ref[...], 0.0)                                         # [E,H]
    h_glob = jnp.mean(h_node, axis=0, keepdims=True)                        # [1,H]
    h_glob = jnp.maximum(
        dot(h_glob, enc_glob_w_ref[...]) + enc_glob_b_ref[...], 0.0)        # [1,H]

    # fused latent heads: [mu | logvar] packed in one 2*z_dim-wide matmul each
    node_stats = dot(h_node, head_node_w_ref[...]) + head_node_b_ref[...]   # [N,2Z]
    edge_stats = dot(h_edge, head_edge_w_ref[...]) + head_edge_b_ref[...]   # [E,2Z]
    glob_stats = dot(h_glob, head_glob_w_ref[...]) + head_glob_b_ref[...]   # [1,2Z]

    z_node_mu, z_node_lv = node_stats[:, :z_dim], node_stats[:, z_dim:]
    z_edge_mu, z_edge_lv = edge_stats[:, :z_dim], edge_stats[:, z_dim:]
    z_glob_mu, z_glob_lv = glob_stats[:, :z_dim], glob_stats[:, z_dim:]

    # ---------------- fused reparameterization (z = mu + eps*exp(0.5*lv)) -----
    z_node = z_node_mu + eps_n_ref[...] * jnp.exp(0.5 * z_node_lv)
    z_edge = z_edge_mu + eps_e_ref[...] * jnp.exp(0.5 * z_edge_lv)
    z_glob = z_glob_mu + eps_g_ref[...] * jnp.exp(0.5 * z_glob_lv)

    # ---------------- decoder (interaction network, hidden=128) ---------------
    x = x_ref[...]
    x_src = dot(send_oh, x)                                                 # [E,Dx]
    x_dst = dot(recv_oh, x)                                                 # [E,Dx]
    # relational (edge) model: Linear on concat == sum of partial matmuls
    eff_h = jnp.maximum(
        dot(x_src, de1_w_src_ref[...])
        + dot(x_dst, de1_w_dst_ref[...])
        + dot(z_edge, de1_w_ze_ref[...])
        + dot(z_glob, de1_w_zg_ref[...])        # [1,128] broadcast over edges
        + de1_b_ref[...], 0.0)                                              # [E,128]
    effects = jnp.maximum(dot(eff_h, de2_w_ref[...]) + de2_b_ref[...], 0.0) # [E,EFF]

    # scatter-add of effects per receiver node
    agg = dot(recv_oh_t, effects)                                           # [N,EFF]

    # object (node) model
    h = jnp.maximum(
        dot(x, dn1_w_x_ref[...])
        + dot(agg, dn1_w_agg_ref[...])
        + dot(z_node, dn1_w_zn_ref[...])
        + dot(z_glob, dn1_w_zg_ref[...])        # [1,128] broadcast over nodes
        + dn1_b_ref[...], 0.0)                                              # [N,128]
    pred = dot(h, dn2_w_ref[...]) + dn2_b_ref[...]                          # [N,Dx]

    # ---------------- write outputs ----------------
    pred_ref[...] = pred
    znmu_ref[...] = z_node_mu
    znlv_ref[...] = z_node_lv
    zemu_ref[...] = z_edge_mu
    zelv_ref[...] = z_edge_lv
    zgmu_ref[...] = z_glob_mu
    zglv_ref[...] = z_glob_lv


# ----------------------------------------------------------------------------
# Parameter construction (deterministic)
# ----------------------------------------------------------------------------
_PARAM_ORDER = (
    "enc_node_w", "enc_node_b",
    "enc_edge_w_src", "enc_edge_w_dst", "enc_edge_b",
    "enc_glob_w", "enc_glob_b",
    "head_node_w", "head_node_b",
    "head_edge_w", "head_edge_b",
    "head_glob_w", "head_glob_b",
    "de1_w_src", "de1_w_dst", "de1_w_ze", "de1_w_zg", "de1_b",
    "de2_w", "de2_b",
    "dn1_w_x", "dn1_w_agg", "dn1_w_zn", "dn1_w_zg", "dn1_b",
    "dn2_w", "dn2_b",
)


def _dense_init(key, fan_in, fan_out):
    kw, kb = jax.random.split(key)
    scale = 1.0 / jnp.sqrt(jnp.float32(fan_in))
    w = jax.random.normal(kw, (fan_in, fan_out), jnp.float32) * scale
    b = jax.random.normal(kb, (1, fan_out), jnp.float32) * 0.01
    return w, b


def init_params(key, *, x_dim, y_dim, z_dim=32, effect_dims=32,
                enc_hidden=32, dec_hidden=128):
    keys = jax.random.split(key, 10)
    p = {}
    # --- encoder (GNN recognition, hidden_size=32, latent_size=z_dim) ---
    p["enc_node_w"], p["enc_node_b"] = _dense_init(keys[0], x_dim + y_dim, enc_hidden)
    w, b = _dense_init(keys[1], 2 * enc_hidden, enc_hidden)   # Linear(2H,H) split by input block
    p["enc_edge_w_src"], p["enc_edge_w_dst"], p["enc_edge_b"] = w[:enc_hidden], w[enc_hidden:], b
    p["enc_glob_w"], p["enc_glob_b"] = _dense_init(keys[2], enc_hidden, enc_hidden)
    # latent heads: mu / logvar fused column-wise -> [H, 2Z]
    for name, kk in (("node", keys[3]), ("edge", keys[4]), ("glob", keys[5])):
        kmu, klv = jax.random.split(kk)
        wmu, bmu = _dense_init(kmu, enc_hidden, z_dim)
        wlv, blv = _dense_init(klv, enc_hidden, z_dim)
        p[f"head_{name}_w"] = jnp.concatenate([wmu, wlv], axis=1)
        p[f"head_{name}_b"] = jnp.concatenate([bmu, blv], axis=1)
    # --- decoder (interaction network, hidden_size=128, effect_dims) ---
    w, b = _dense_init(keys[6], 2 * x_dim + 2 * z_dim, dec_hidden)   # edge MLP layer 1, split
    p["de1_w_src"] = w[:x_dim]
    p["de1_w_dst"] = w[x_dim:2 * x_dim]
    p["de1_w_ze"] = w[2 * x_dim:2 * x_dim + z_dim]
    p["de1_w_zg"] = w[2 * x_dim + z_dim:]
    p["de1_b"] = b
    p["de2_w"], p["de2_b"] = _dense_init(keys[7], dec_hidden, effect_dims)
    w, b = _dense_init(keys[8], x_dim + effect_dims + 2 * z_dim, dec_hidden)  # node MLP layer 1, split
    p["dn1_w_x"] = w[:x_dim]
    p["dn1_w_agg"] = w[x_dim:x_dim + effect_dims]
    p["dn1_w_zn"] = w[x_dim + effect_dims:x_dim + effect_dims + z_dim]
    p["dn1_w_zg"] = w[x_dim + effect_dims + z_dim:]
    p["dn1_b"] = b
    p["dn2_w"], p["dn2_b"] = _dense_init(keys[9], dec_hidden, x_dim)
    return p


# ----------------------------------------------------------------------------
# PhysicsVAE forward: one fused pallas_call
# ----------------------------------------------------------------------------
def physics_vae_forward(params, x, y, edge_index, rng_key):
    n_nodes, x_dim = x.shape
    n_edges = edge_index.shape[1]
    z_dim = params["head_node_w"].shape[1] // 2

    senders = edge_index[0].astype(jnp.int32)
    receivers = edge_index[1].astype(jnp.int32)
    send_col = senders.reshape(n_edges, 1)
    recv_col = receivers.reshape(n_edges, 1)
    recv_row = receivers.reshape(1, n_edges)

    x_f = x.astype(jnp.float32)
    xy = jnp.concatenate([x_f, y.astype(jnp.float32)], axis=-1)

    k1, k2, k3 = jax.random.split(rng_key, 3)
    eps_n = jax.random.normal(k1, (n_nodes, z_dim), jnp.float32)
    eps_e = jax.random.normal(k2, (n_edges, z_dim), jnp.float32)
    eps_g = jax.random.normal(k3, (1, z_dim), jnp.float32)

    inputs = [send_col, recv_col, recv_row, xy, x_f, eps_n, eps_e, eps_g]
    inputs += [params[name].astype(jnp.float32) for name in _PARAM_ORDER]

    def full_spec(a):
        return pl.BlockSpec(a.shape, lambda i: (0, 0))

    in_specs = [full_spec(a) for a in inputs]

    out_shape = (
        jax.ShapeDtypeStruct((n_nodes, x_dim), jnp.float32),   # pred
        jax.ShapeDtypeStruct((n_nodes, z_dim), jnp.float32),   # z_node_mu
        jax.ShapeDtypeStruct((n_nodes, z_dim), jnp.float32),   # z_node_logvar
        jax.ShapeDtypeStruct((n_edges, z_dim), jnp.float32),   # z_edge_mu
        jax.ShapeDtypeStruct((n_edges, z_dim), jnp.float32),   # z_edge_logvar
        jax.ShapeDtypeStruct((1, z_dim), jnp.float32),         # z_global_mu
        jax.ShapeDtypeStruct((1, z_dim), jnp.float32),         # z_global_logvar
    )
    out_specs = tuple(pl.BlockSpec(s.shape, lambda i: (0, 0)) for s in out_shape)

    kernel = functools.partial(_fused_physics_vae_kernel, z_dim=z_dim)
    outs = pl.pallas_call(
        kernel,
        grid=(1,),
        in_specs=in_specs,
        out_specs=out_specs,
        out_shape=out_shape,
        compiler_params=pltpu.CompilerParams(dimension_semantics=("arbitrary",)),
    )(*inputs)

    pred = outs[0]
    z_stats = tuple(outs[1:])
    return pred, z_stats


# ----------------------------------------------------------------------------
# Main
# ----------------------------------------------------------------------------
if __name__ == "__main__":
    key = jax.random.PRNGKey(0)
    k_param, k_x, k_y, k_eps = jax.random.split(key, 4)

    N_NODES = 8
    X_DIM = 6     # e.g. 2D position + velocity + attrs
    Y_DIM = 6     # next-step observation, concatenated with x for recognition
    Z_DIM = 32
    EFFECT_DIMS = 32

    # bidirectional ring graph over 8 nodes -> 16 directed edges
    src = jnp.arange(N_NODES, dtype=jnp.int32)
    dst = (src + 1) % N_NODES
    edge_index = jnp.stack(
        [jnp.concatenate([src, dst]), jnp.concatenate([dst, src])], axis=0
    )  # [2, 16] int32

    x = jax.random.normal(k_x, (N_NODES, X_DIM), jnp.float32)
    y = jax.random.normal(k_y, (N_NODES, Y_DIM), jnp.float32)

    params = init_params(k_param, x_dim=X_DIM, y_dim=Y_DIM,
                         z_dim=Z_DIM, effect_dims=EFFECT_DIMS)

    fwd = jax.jit(physics_vae_forward)
    pred, z_stats = fwd(params, x, y, edge_index, k_eps)
    pred = jax.block_until_ready(pred)
    z_stats = jax.block_until_ready(z_stats)

    assert pred.shape == (N_NODES, X_DIM)
    assert z_stats[0].shape == (N_NODES, Z_DIM)                 # z_node_mu
    assert z_stats[2].shape == (edge_index.shape[1], Z_DIM)     # z_edge_mu
    assert z_stats[4].shape == (1, Z_DIM)                       # z_global_mu
    assert all(bool(jnp.all(jnp.isfinite(s))) for s in z_stats)
    assert bool(jnp.all(jnp.isfinite(pred)))

    print("KERNEL_OK")
</pallas_src>

<mosaic_0001>
module attributes {stable_mosaic.version = 11 : i64} {
  func.func @_fused_physics_vae_kernel(%arg0: i32, %arg1: memref<16x1xi32, #tpu.memory_space<vmem>>, %arg2: memref<16x1xi32, #tpu.memory_space<vmem>>, %arg3: memref<1x16xi32, #tpu.memory_space<vmem>>, %arg4: memref<8x12xf32, #tpu.memory_space<vmem>>, %arg5: memref<8x6xf32, #tpu.memory_space<vmem>>, %arg6: memref<8x32xf32, #tpu.memory_space<vmem>>, %arg7: memref<16x32xf32, #tpu.memory_space<vmem>>, %arg8: memref<1x32xf32, #tpu.memory_space<vmem>>, %arg9: memref<12x32xf32, #tpu.memory_space<vmem>>, %arg10: memref<1x32xf32, #tpu.memory_space<vmem>>, %arg11: memref<32x32xf32, #tpu.memory_space<vmem>>, %arg12: memref<32x32xf32, #tpu.memory_space<vmem>>, %arg13: memref<1x32xf32, #tpu.memory_space<vmem>>, %arg14: memref<32x32xf32, #tpu.memory_space<vmem>>, %arg15: memref<1x32xf32, #tpu.memory_space<vmem>>, %arg16: memref<32x64xf32, #tpu.memory_space<vmem>>, %arg17: memref<1x64xf32, #tpu.memory_space<vmem>>, %arg18: memref<32x64xf32, #tpu.memory_space<vmem>>, %arg19: memref<1x64xf32, #tpu.memory_space<vmem>>, %arg20: memref<32x64xf32, #tpu.memory_space<vmem>>, %arg21: memref<1x64xf32, #tpu.memory_space<vmem>>, %arg22: memref<6x128xf32, #tpu.memory_space<vmem>>, %arg23: memref<6x128xf32, #tpu.memory_space<vmem>>, %arg24: memref<32x128xf32, #tpu.memory_space<vmem>>, %arg25: memref<32x128xf32, #tpu.memory_space<vmem>>, %arg26: memref<1x128xf32, #tpu.memory_space<vmem>>, %arg27: memref<128x32xf32, #tpu.memory_space<vmem>>, %arg28: memref<1x32xf32, #tpu.memory_space<vmem>>, %arg29: memref<6x128xf32, #tpu.memory_space<vmem>>, %arg30: memref<32x128xf32, #tpu.memory_space<vmem>>, %arg31: memref<32x128xf32, #tpu.memory_space<vmem>>, %arg32: memref<32x128xf32, #tpu.memory_space<vmem>>, %arg33: memref<1x128xf32, #tpu.memory_space<vmem>>, %arg34: memref<128x6xf32, #tpu.memory_space<vmem>>, %arg35: memref<1x6xf32, #tpu.memory_space<vmem>>, %arg36: memref<8x6xf32, #tpu.memory_space<vmem>>, %arg37: memref<8x32xf32, #tpu.memory_space<vmem>>, %arg38: memref<8x32xf32, #tpu.memory_space<vmem>>, %arg39: memref<16x32xf32, #tpu.memory_space<vmem>>, %arg40: memref<16x32xf32, #tpu.memory_space<vmem>>, %arg41: memref<1x32xf32, #tpu.memory_space<vmem>>, %arg42: memref<1x32xf32, #tpu.memory_space<vmem>>) attributes {dimension_semantics = [#tpu.dimension_semantics<arbitrary>], iteration_bounds = array<i64: 1>, scalar_prefetch = 0 : i64, scratch_operands = 0 : i64, tpu.core_type = #tpu.core_type<tc>, window_params = [{pipeline_mode = #tpu.pipeline_mode<synchronous>, transform_indices = @transform_0, window_bounds = array<i64: 16, 1>}, {pipeline_mode = #tpu.pipeline_mode<synchronous>, transform_indices = @transform_1, window_bounds = array<i64: 16, 1>}, {pipeline_mode = #tpu.pipeline_mode<synchronous>, transform_indices = @transform_2, window_bounds = array<i64: 1, 16>}, {pipeline_mode = #tpu.pipeline_mode<synchronous>, transform_indices = @transform_3, window_bounds = array<i64: 8, 12>}, {pipeline_mode = #tpu.pipeline_mode<synchronous>, transform_indices = @transform_4, window_bounds = array<i64: 8, 6>}, {pipeline_mode = #tpu.pipeline_mode<synchronous>, transform_indices = @transform_5, window_bounds = array<i64: 8, 32>}, {pipeline_mode = #tpu.pipeline_mode<synchronous>, transform_indices = @transform_6, window_bounds = array<i64: 16, 32>}, {pipeline_mode = #tpu.pipeline_mode<synchronous>, transform_indices = @transform_7, window_bounds = array<i64: 1, 32>}, {pipeline_mode = #tpu.pipeline_mode<synchronous>, transform_indices = @transform_8, window_bounds = array<i64: 12, 32>}, {pipeline_mode = #tpu.pipeline_mode<synchronous>, transform_indices = @transform_9, window_bounds = array<i64: 1, 32>}, {pipeline_mode = #tpu.pipeline_mode<synchronous>, transform_indices = @transform_10, window_bounds = array<i64: 32, 32>}, {pipeline_mode = #tpu.pipeline_mode<synchronous>, transform_indices = @transform_11, window_bounds = array<i64: 32, 32>}, {pipeline_mode = #tpu.pipeline_mode<synchronous>, transform_indices = @transform_12, window_bounds = array<i64: 1, 32>}, {pipeline_mode = #tpu.pipeline_mode<synchronous>, transform_indices = @transform_13, window_bounds = array<i64: 32, 32>}, {pipeline_mode = #tpu.pipeline_mode<synchronous>, transform_indices = @transform_14, window_bounds = array<i64: 1, 32>}, {pipeline_mode = #tpu.pipeline_mode<synchronous>, transform_indices = @transform_15, window_bounds = array<i64: 32, 64>}, {pipeline_mode = #tpu.pipeline_mode<synchronous>, transform_indices = @transform_16, window_bounds = array<i64: 1, 64>}, {pipeline_mode = #tpu.pipeline_mode<synchronous>, transform_indices = @transform_17, window_bounds = array<i64: 32, 64>}, {pipeline_mode = #tpu.pipeline_mode<synchronous>, transform_indices = @transform_18, window_bounds = array<i64: 1, 64>}, {pipeline_mode = #tpu.pipeline_mode<synchronous>, transform_indices = @transform_19, window_bounds = array<i64: 32, 64>}, {pipeline_mode = #tpu.pipeline_mode<synchronous>, transform_indices = @transform_20, window_bounds = array<i64: 1, 64>}, {pipeline_mode = #tpu.pipeline_mode<synchronous>, transform_indices = @transform_21, window_bounds = array<i64: 6, 128>}, {pipeline_mode = #tpu.pipeline_mode<synchronous>, transform_indices = @transform_22, window_bounds = array<i64: 6, 128>}, {pipeline_mode = #tpu.pipeline_mode<synchronous>, transform_indices = @transform_23, window_bounds = array<i64: 32, 128>}, {pipeline_mode = #tpu.pipeline_mode<synchronous>, transform_indices = @transform_24, window_bounds = array<i64: 32, 128>}, {pipeline_mode = #tpu.pipeline_mode<synchronous>, transform_indices = @transform_25, window_bounds = array<i64: 1, 128>}, {pipeline_mode = #tpu.pipeline_mode<synchronous>, transform_indices = @transform_26, window_bounds = array<i64: 128, 32>}, {pipeline_mode = #tpu.pipeline_mode<synchronous>, transform_indices = @transform_27, window_bounds = array<i64: 1, 32>}, {pipeline_mode = #tpu.pipeline_mode<synchronous>, transform_indices = @transform_28, window_bounds = array<i64: 6, 128>}, {pipeline_mode = #tpu.pipeline_mode<synchronous>, transform_indices = @transform_29, window_bounds = array<i64: 32, 128>}, {pipeline_mode = #tpu.pipeline_mode<synchronous>, transform_indices = @transform_30, window_bounds = array<i64: 32, 128>}, {pipeline_mode = #tpu.pipeline_mode<synchronous>, transform_indices = @transform_31, window_bounds = array<i64: 32, 128>}, {pipeline_mode = #tpu.pipeline_mode<synchronous>, transform_indices = @transform_32, window_bounds = array<i64: 1, 128>}, {pipeline_mode = #tpu.pipeline_mode<synchronous>, transform_indices = @transform_33, window_bounds = array<i64: 128, 6>}, {pipeline_mode = #tpu.pipeline_mode<synchronous>, transform_indices = @transform_34, window_bounds = array<i64: 1, 6>}, {pipeline_mode = #tpu.pipeline_mode<synchronous>, transform_indices = @transform_35, window_bounds = array<i64: 8, 6>}, {pipeline_mode = #tpu.pipeline_mode<synchronous>, transform_indices = @transform_36, window_bounds = array<i64: 8, 32>}, {pipeline_mode = #tpu.pipeline_mode<synchronous>, transform_indices = @transform_37, window_bounds = array<i64: 8, 32>}, {pipeline_mode = #tpu.pipeline_mode<synchronous>, transform_indices = @transform_38, window_bounds = array<i64: 16, 32>}, {pipeline_mode = #tpu.pipeline_mode<synchronous>, transform_indices = @transform_39, window_bounds = array<i64: 16, 32>}, {pipeline_mode = #tpu.pipeline_mode<synchronous>, transform_indices = @transform_40, window_bounds = array<i64: 1, 32>}, {pipeline_mode = #tpu.pipeline_mode<synchronous>, transform_indices = @transform_41, window_bounds = array<i64: 1, 32>}]} {
    %0 = tpu.iota {dimensions = array<i32: 1>} : vector<16x8xi32>
    %c0 = arith.constant 0 : index
    %c0_0 = arith.constant 0 : index
    %1 = vector.load %arg1[%c0, %c0_0] : memref<16x1xi32, #tpu.memory_space<vmem>>, vector<16x1xi32>
    %2 = vector.broadcast %1 : vector<16x1xi32> to vector<16x8xi32>
    %3 = arith.cmpi eq, %0, %2 : vector<16x8xi32>
    %4 = arith.extui %3 : vector<16x8xi1> to vector<16x8xi32>
    %5 = arith.sitofp %4 : vector<16x8xi32> to vector<16x8xf32>
    %c0_1 = arith.constant 0 : index
    %c0_2 = arith.constant 0 : index
    %6 = vector.load %arg2[%c0_1, %c0_2] : memref<16x1xi32, #tpu.memory_space<vmem>>, vector<16x1xi32>
    %7 = vector.broadcast %6 : vector<16x1xi32> to vector<16x8xi32>
    %8 = arith.cmpi eq, %0, %7 : vector<16x8xi32>
    %9 = arith.extui %8 : vector<16x8xi1> to vector<16x8xi32>
    %10 = arith.sitofp %9 : vector<16x8xi32> to vector<16x8xf32>
    %11 = tpu.iota {dimensions = array<i32: 0>} : vector<8x16xi32>
    %c0_3 = arith.constant 0 : index
    %c0_4 = arith.constant 0 : index
    %12 = vector.load %arg3[%c0_3, %c0_4] : memref<1x16xi32, #tpu.memory_space<vmem>>, vector<1x16xi32>
    %13 = vector.broadcast %12 : vector<1x16xi32> to vector<8x16xi32>
    %14 = arith.cmpi eq, %11, %13 : vector<8x16xi32>
    %15 = arith.extui %14 : vector<8x16xi1> to vector<8x16xi32>
    %16 = arith.sitofp %15 : vector<8x16xi32> to vector<8x16xf32>
    %c0_5 = arith.constant 0 : index
    %c0_6 = arith.constant 0 : index
    %17 = vector.load %arg4[%c0_5, %c0_6] : memref<8x12xf32, #tpu.memory_space<vmem>>, vector<8x12xf32>
    %c0_7 = arith.constant 0 : index
    %c0_8 = arith.constant 0 : index
    %18 = vector.load %arg9[%c0_7, %c0_8] : memref<12x32xf32, #tpu.memory_space<vmem>>, vector<12x32xf32>
    %cst = arith.constant dense<0.000000e+00> : vector<8x32xf32>
    %19 = tpu.matmul %17, %18, %cst {dimension_numbers = #tpu.dot_dimension_numbers<[1], [0], [0], [1], [0, 0, 1, 1], [], []>} : vector<8x12xf32>, vector<12x32xf32>, vector<8x32xf32> -> vector<8x32xf32>
    %c0_9 = arith.constant 0 : index
    %c0_10 = arith.constant 0 : index
    %20 = vector.load %arg10[%c0_9, %c0_10] : memref<1x32xf32, #tpu.memory_space<vmem>>, vector<1x32xf32>
    %21 = vector.broadcast %20 : vector<1x32xf32> to vector<8x32xf32>
    %22 = arith.addf %19, %21 : vector<8x32xf32>
    %cst_11 = arith.constant 0.000000e+00 : f32
    %23 = vector.broadcast %cst_11 : f32 to vector<8x32xf32>
    %24 = arith.maximumf %22, %23 : vector<8x32xf32>
    %cst_12 = arith.constant dense<0.000000e+00> : vector<16x32xf32>
    %25 = tpu.matmul %5, %24, %cst_12 {dimension_numbers = #tpu.dot_dimension_numbers<[1], [0], [0], [1], [0, 0, 1, 1], [], []>} : vector<16x8xf32>, vector<8x32xf32>, vector<16x32xf32> -> vector<16x32xf32>
    %cst_13 = arith.constant dense<0.000000e+00> : vector<16x32xf32>
    %26 = tpu.matmul %10, %24, %cst_13 {dimension_numbers = #tpu.dot_dimension_numbers<[1], [0], [0], [1], [0, 0, 1, 1], [], []>} : vector<16x8xf32>, vector<8x32xf32>, vector<16x32xf32> -> vector<16x32xf32>
    %c0_14 = arith.constant 0 : index
    %c0_15 = arith.constant 0 : index
    %27 = vector.load %arg11[%c0_14, %c0_15] : memref<32x32xf32, #tpu.memory_space<vmem>>, vector<32x32xf32>
    %cst_16 = arith.constant dense<0.000000e+00> : vector<16x32xf32>
    %28 = tpu.matmul %25, %27, %cst_16 {dimension_numbers = #tpu.dot_dimension_numbers<[1], [0], [0], [1], [0, 0, 1, 1], [], []>} : vector<16x32xf32>, vector<32x32xf32>, vector<16x32xf32> -> vector<16x32xf32>
    %c0_17 = arith.constant 0 : index
    %c0_18 = arith.constant 0 : index
    %29 = vector.load %arg12[%c0_17, %c0_18] : memref<32x32xf32, #tpu.memory_space<vmem>>, vector<32x32xf32>
    %cst_19 = arith.constant dense<0.000000e+00> : vector<16x32xf32>
    %30 = tpu.matmul %26, %29, %cst_19 {dimension_numbers = #tpu.dot_dimension_numbers<[1], [0], [0], [1], [0, 0, 1, 1], [], []>} : vector<16x32xf32>, vector<32x32xf32>, vector<16x32xf32> -> vector<16x32xf32>
    %31 = arith.addf %28, %30 : vector<16x32xf32>
    %c0_20 = arith.constant 0 : index
    %c0_21 = arith.constant 0 : index
    %32 = vector.load %arg13[%c0_20, %c0_21] : memref<1x32xf32, #tpu.memory_space<vmem>>, vector<1x32xf32>
    %33 = vector.broadcast %32 : vector<1x32xf32> to vector<16x32xf32>
    %34 = arith.addf %31, %33 : vector<16x32xf32>
    %cst_22 = arith.constant 0.000000e+00 : f32
    %35 = vector.broadcast %cst_22 : f32 to vector<16x32xf32>
    %36 = arith.maximumf %34, %35 : vector<16x32xf32>
    %cst_23 = arith.constant dense<0.000000e+00> : vector<32xf32>
    %37 = vector.multi_reduction <add>, %24, %cst_23 [0] : vector<8x32xf32> to vector<32xf32>
    %38 = vector.shape_cast %37 : vector<32xf32> to vector<1x32xf32>
    %cst_24 = arith.constant 8.000000e+00 : f32
    %39 = vector.broadcast %cst_24 : f32 to vector<1x32xf32>
    %40 = arith.divf %38, %39 : vector<1x32xf32>
    %c0_25 = arith.constant 0 : index
    %c0_26 = arith.constant 0 : index
    %41 = vector.load %arg14[%c0_25, %c0_26] : memref<32x32xf32, #tpu.memory_space<vmem>>, vector<32x32xf32>
    %cst_27 = arith.constant dense<0.000000e+00> : vector<1x32xf32>
    %42 = tpu.matmul %40, %41, %cst_27 {dimension_numbers = #tpu.dot_dimension_numbers<[1], [0], [0], [1], [0, 0, 1, 1], [], []>} : vector<1x32xf32>, vector<32x32xf32>, vector<1x32xf32> -> vector<1x32xf32>
    %c0_28 = arith.constant 0 : index
    %c0_29 = arith.constant 0 : index
    %43 = vector.load %arg15[%c0_28, %c0_29] : memref<1x32xf32, #tpu.memory_space<vmem>>, vector<1x32xf32>
    %44 = arith.addf %42, %43 : vector<1x32xf32>
    %cst_30 = arith.constant 0.000000e+00 : f32
    %45 = vector.broadcast %cst_30 : f32 to vector<1x32xf32>
    %46 = arith.maximumf %44, %45 : vector<1x32xf32>
    %c0_31 = arith.constant 0 : index
    %c0_32 = arith.constant 0 : index
    %47 = vector.load %arg16[%c0_31, %c0_32] : memref<32x64xf32, #tpu.memory_space<vmem>>, vector<32x64xf32>
    %cst_33 = arith.constant dense<0.000000e+00> : vector<8x64xf32>
    %48 = tpu.matmul %24, %47, %cst_33 {dimension_numbers = #tpu.dot_dimension_numbers<[1], [0], [0], [1], [0, 0, 1, 1], [], []>} : vector<8x32xf32>, vector<32x64xf32>, vector<8x64xf32> -> vector<8x64xf32>
    %c0_34 = arith.constant 0 : index
    %c0_35 = arith.constant 0 : index
    %49 = vector.load %arg17[%c0_34, %c0_35] : memref<1x64xf32, #tpu.memory_space<vmem>>, vector<1x64xf32>
    %50 = vector.broadcast %49 : vector<1x64xf32> to vector<8x64xf32>
    %51 = arith.addf %48, %50 : vector<8x64xf32>
    %c0_36 = arith.constant 0 : index
    %c0_37 = arith.constant 0 : index
    %52 = vector.load %arg18[%c0_36, %c0_37] : memref<32x64xf32, #tpu.memory_space<vmem>>, vector<32x64xf32>
    %cst_38 = arith.constant dense<0.000000e+00> : vector<16x64xf32>
    %53 = tpu.matmul %36, %52, %cst_38 {dimension_numbers = #tpu.dot_dimension_numbers<[1], [0], [0], [1], [0, 0, 1, 1], [], []>} : vector<16x32xf32>, vector<32x64xf32>, vector<16x64xf32> -> vector<16x64xf32>
    %c0_39 = arith.constant 0 : index
    %c0_40 = arith.constant 0 : index
    %54 = vector.load %arg19[%c0_39, %c0_40] : memref<1x64xf32, #tpu.memory_space<vmem>>, vector<1x64xf32>
    %55 = vector.broadcast %54 : vector<1x64xf32> to vector<16x64xf32>
    %56 = arith.addf %53, %55 : vector<16x64xf32>
    %c0_41 = arith.constant 0 : index
    %c0_42 = arith.constant 0 : index
    %57 = vector.load %arg20[%c0_41, %c0_42] : memref<32x64xf32, #tpu.memory_space<vmem>>, vector<32x64xf32>
    %cst_43 = arith.constant dense<0.000000e+00> : vector<1x64xf32>
    %58 = tpu.matmul %46, %57, %cst_43 {dimension_numbers = #tpu.dot_dimension_numbers<[1], [0], [0], [1], [0, 0, 1, 1], [], []>} : vector<1x32xf32>, vector<32x64xf32>, vector<1x64xf32> -> vector<1x64xf32>
    %c0_44 = arith.constant 0 : index
    %c0_45 = arith.constant 0 : index
    %59 = vector.load %arg21[%c0_44, %c0_45] : memref<1x64xf32, #tpu.memory_space<vmem>>, vector<1x64xf32>
    %60 = arith.addf %58, %59 : vector<1x64xf32>
    %61 = vector.extract_strided_slice %51 {offsets = [0, 0], sizes = [8, 32], strides = [1, 1]} : vector<8x64xf32> to vector<8x32xf32>
    %62 = vector.extract_strided_slice %51 {offsets = [0, 32], sizes = [8, 32], strides = [1, 1]} : vector<8x64xf32> to vector<8x32xf32>
    %63 = vector.extract_strided_slice %56 {offsets = [0, 0], sizes = [16, 32], strides = [1, 1]} : vector<16x64xf32> to vector<16x32xf32>
    %64 = vector.extract_strided_slice %56 {offsets = [0, 32], sizes = [16, 32], strides = [1, 1]} : vector<16x64xf32> to vector<16x32xf32>
    %65 = vector.extract_strided_slice %60 {offsets = [0, 0], sizes = [1, 32], strides = [1, 1]} : vector<1x64xf32> to vector<1x32xf32>
    %66 = vector.extract_strided_slice %60 {offsets = [0, 32], sizes = [1, 32], strides = [1, 1]} : vector<1x64xf32> to vector<1x32xf32>
    %c0_46 = arith.constant 0 : index
    %c0_47 = arith.constant 0 : index
    %67 = vector.load %arg6[%c0_46, %c0_47] : memref<8x32xf32, #tpu.memory_space<vmem>>, vector<8x32xf32>
    %cst_48 = arith.constant 5.000000e-01 : f32
    %68 = vector.broadcast %cst_48 : f32 to vector<8x32xf32>
    %69 = arith.mulf %68, %62 : vector<8x32xf32>
    %70 = math.exp %69 : vector<8x32xf32>
    %71 = arith.mulf %67, %70 : vector<8x32xf32>
    %72 = arith.addf %61, %71 : vector<8x32xf32>
    %c0_49 = arith.constant 0 : index
    %c0_50 = arith.constant 0 : index
    %73 = vector.load %arg7[%c0_49, %c0_50] : memref<16x32xf32, #tpu.memory_space<vmem>>, vector<16x32xf32>
    %cst_51 = arith.constant 5.000000e-01 : f32
    %74 = vector.broadcast %cst_51 : f32 to vector<16x32xf32>
    %75 = arith.mulf %74, %64 : vector<16x32xf32>
    %76 = math.exp %75 : vector<16x32xf32>
    %77 = arith.mulf %73, %76 : vector<16x32xf32>
    %78 = arith.addf %63, %77 : vector<16x32xf32>
    %c0_52 = arith.constant 0 : index
    %c0_53 = arith.constant 0 : index
    %79 = vector.load %arg8[%c0_52, %c0_53] : memref<1x32xf32, #tpu.memory_space<vmem>>, vector<1x32xf32>
    %cst_54 = arith.constant 5.000000e-01 : f32
    %80 = vector.broadcast %cst_54 : f32 to vector<1x32xf32>
    %81 = arith.mulf %80, %66 : vector<1x32xf32>
    %82 = math.exp %81 : vector<1x32xf32>
    %83 = arith.mulf %79, %82 : vector<1x32xf32>
    %84 = arith.addf %65, %83 : vector<1x32xf32>
    %c0_55 = arith.constant 0 : index
    %c0_56 = arith.constant 0 : index
    %85 = vector.load %arg5[%c0_55, %c0_56] : memref<8x6xf32, #tpu.memory_space<vmem>>, vector<8x6xf32>
    %cst_57 = arith.constant dense<0.000000e+00> : vector<16x6xf32>
    %86 = tpu.matmul %5, %85, %cst_57 {dimension_numbers = #tpu.dot_dimension_numbers<[1], [0], [0], [1], [0, 0, 1, 1], [], []>} : vector<16x8xf32>, vector<8x6xf32>, vector<16x6xf32> -> vector<16x6xf32>
    %cst_58 = arith.constant dense<0.000000e+00> : vector<16x6xf32>
    %87 = tpu.matmul %10, %85, %cst_58 {dimension_numbers = #tpu.dot_dimension_numbers<[1], [0], [0], [1], [0, 0, 1, 1], [], []>} : vector<16x8xf32>, vector<8x6xf32>, vector<16x6xf32> -> vector<16x6xf32>
    %c0_59 = arith.constant 0 : index
    %c0_60 = arith.constant 0 : index
    %88 = vector.load %arg22[%c0_59, %c0_60] : memref<6x128xf32, #tpu.memory_space<vmem>>, vector<6x128xf32>
    %cst_61 = arith.constant dense<0.000000e+00> : vector<16x128xf32>
    %89 = tpu.matmul %86, %88, %cst_61 {dimension_numbers = #tpu.dot_dimension_numbers<[1], [0], [0], [1], [0, 0, 1, 1], [], []>} : vector<16x6xf32>, vector<6x128xf32>, vector<16x128xf32> -> vector<16x128xf32>
    %c0_62 = arith.constant 0 : index
    %c0_63 = arith.constant 0 : index
    %90 = vector.load %arg23[%c0_62, %c0_63] : memref<6x128xf32, #tpu.memory_space<vmem>>, vector<6x128xf32>
    %cst_64 = arith.constant dense<0.000000e+00> : vector<16x128xf32>
    %91 = tpu.matmul %87, %90, %cst_64 {dimension_numbers = #tpu.dot_dimension_numbers<[1], [0], [0], [1], [0, 0, 1, 1], [], []>} : vector<16x6xf32>, vector<6x128xf32>, vector<16x128xf32> -> vector<16x128xf32>
    %92 = arith.addf %89, %91 : vector<16x128xf32>
    %c0_65 = arith.constant 0 : index
    %c0_66 = arith.constant 0 : index
    %93 = vector.load %arg24[%c0_65, %c0_66] : memref<32x128xf32, #tpu.memory_space<vmem>>, vector<32x128xf32>
    %cst_67 = arith.constant dense<0.000000e+00> : vector<16x128xf32>
    %94 = tpu.matmul %78, %93, %cst_67 {dimension_numbers = #tpu.dot_dimension_numbers<[1], [0], [0], [1], [0, 0, 1, 1], [], []>} : vector<16x32xf32>, vector<32x128xf32>, vector<16x128xf32> -> vector<16x128xf32>
    %95 = arith.addf %92, %94 : vector<16x128xf32>
    %c0_68 = arith.constant 0 : index
    %c0_69 = arith.constant 0 : index
    %96 = vector.load %arg25[%c0_68, %c0_69] : memref<32x128xf32, #tpu.memory_space<vmem>>, vector<32x128xf32>
    %cst_70 = arith.constant dense<0.000000e+00> : vector<1x128xf32>
    %97 = tpu.matmul %84, %96, %cst_70 {dimension_numbers = #tpu.dot_dimension_numbers<[1], [0], [0], [1], [0, 0, 1, 1], [], []>} : vector<1x32xf32>, vector<32x128xf32>, vector<1x128xf32> -> vector<1x128xf32>
    %98 = vector.broadcast %97 : vector<1x128xf32> to vector<16x128xf32>
    %99 = arith.addf %95, %98 : vector<16x128xf32>
    %c0_71 = arith.constant 0 : index
    %c0_72 = arith.constant 0 : index
    %100 = vector.load %arg26[%c0_71, %c0_72] : memref<1x128xf32, #tpu.memory_space<vmem>>, vector<1x128xf32>
    %101 = vector.broadcast %100 : vector<1x128xf32> to vector<16x128xf32>
    %102 = arith.addf %99, %101 : vector<16x128xf32>
    %cst_73 = arith.constant 0.000000e+00 : f32
    %103 = vector.broadcast %cst_73 : f32 to vector<16x128xf32>
    %104 = arith.maximumf %102, %103 : vector<16x128xf32>
    %c0_74 = arith.constant 0 : index
    %c0_75 = arith.constant 0 : index
    %105 = vector.load %arg27[%c0_74, %c0_75] : memref<128x32xf32, #tpu.memory_space<vmem>>, vector<128x32xf32>
    %cst_76 = arith.constant dense<0.000000e+00> : vector<16x32xf32>
    %106 = tpu.matmul %104, %105, %cst_76 {dimension_numbers = #tpu.dot_dimension_numbers<[1], [0], [0], [1], [0, 0, 1, 1], [], []>} : vector<16x128xf32>, vector<128x32xf32>, vector<16x32xf32> -> vector<16x32xf32>
    %c0_77 = arith.constant 0 : index
    %c0_78 = arith.constant 0 : index
    %107 = vector.load %arg28[%c0_77, %c0_78] : memref<1x32xf32, #tpu.memory_space<vmem>>, vector<1x32xf32>
    %108 = vector.broadcast %107 : vector<1x32xf32> to vector<16x32xf32>
    %109 = arith.addf %106, %108 : vector<16x32xf32>
    %cst_79 = arith.constant 0.000000e+00 : f32
    %110 = vector.broadcast %cst_79 : f32 to vector<16x32xf32>
    %111 = arith.maximumf %109, %110 : vector<16x32xf32>
    %cst_80 = arith.constant dense<0.000000e+00> : vector<8x32xf32>
    %112 = tpu.matmul %16, %111, %cst_80 {dimension_numbers = #tpu.dot_dimension_numbers<[1], [0], [0], [1], [0, 0, 1, 1], [], []>} : vector<8x16xf32>, vector<16x32xf32>, vector<8x32xf32> -> vector<8x32xf32>
    %c0_81 = arith.constant 0 : index
    %c0_82 = arith.constant 0 : index
    %113 = vector.load %arg29[%c0_81, %c0_82] : memref<6x128xf32, #tpu.memory_space<vmem>>, vector<6x128xf32>
    %cst_83 = arith.constant dense<0.000000e+00> : vector<8x128xf32>
    %114 = tpu.matmul %85, %113, %cst_83 {dimension_numbers = #tpu.dot_dimension_numbers<[1], [0], [0], [1], [0, 0, 1, 1], [], []>} : vector<8x6xf32>, vector<6x128xf32>, vector<8x128xf32> -> vector<8x128xf32>
    %c0_84 = arith.constant 0 : index
    %c0_85 = arith.constant 0 : index
    %115 = vector.load %arg30[%c0_84, %c0_85] : memref<32x128xf32, #tpu.memory_space<vmem>>, vector<32x128xf32>
    %cst_86 = arith.constant dense<0.000000e+00> : vector<8x128xf32>
    %116 = tpu.matmul %112, %115, %cst_86 {dimension_numbers = #tpu.dot_dimension_numbers<[1], [0], [0], [1], [0, 0, 1, 1], [], []>} : vector<8x32xf32>, vector<32x128xf32>, vector<8x128xf32> -> vector<8x128xf32>
    %117 = arith.addf %114, %116 : vector<8x128xf32>
    %c0_87 = arith.constant 0 : index
    %c0_88 = arith.constant 0 : index
    %118 = vector.load %arg31[%c0_87, %c0_88] : memref<32x128xf32, #tpu.memory_space<vmem>>, vector<32x128xf32>
    %cst_89 = arith.constant dense<0.000000e+00> : vector<8x128xf32>
    %119 = tpu.matmul %72, %118, %cst_89 {dimension_numbers = #tpu.dot_dimension_numbers<[1], [0], [0], [1], [0, 0, 1, 1], [], []>} : vector<8x32xf32>, vector<32x128xf32>, vector<8x128xf32> -> vector<8x128xf32>
    %120 = arith.addf %117, %119 : vector<8x128xf32>
    %c0_90 = arith.constant 0 : index
    %c0_91 = arith.constant 0 : index
    %121 = vector.load %arg32[%c0_90, %c0_91] : memref<32x128xf32, #tpu.memory_space<vmem>>, vector<32x128xf32>
    %cst_92 = arith.constant dense<0.000000e+00> : vector<1x128xf32>
    %122 = tpu.matmul %84, %121, %cst_92 {dimension_numbers = #tpu.dot_dimension_numbers<[1], [0], [0], [1], [0, 0, 1, 1], [], []>} : vector<1x32xf32>, vector<32x128xf32>, vector<1x128xf32> -> vector<1x128xf32>
    %123 = vector.broadcast %122 : vector<1x128xf32> to vector<8x128xf32>
    %124 = arith.addf %120, %123 : vector<8x128xf32>
    %c0_93 = arith.constant 0 : index
    %c0_94 = arith.constant 0 : index
    %125 = vector.load %arg33[%c0_93, %c0_94] : memref<1x128xf32, #tpu.memory_space<vmem>>, vector<1x128xf32>
    %126 = vector.broadcast %125 : vector<1x128xf32> to vector<8x128xf32>
    %127 = arith.addf %124, %126 : vector<8x128xf32>
    %cst_95 = arith.constant 0.000000e+00 : f32
    %128 = vector.broadcast %cst_95 : f32 to vector<8x128xf32>
    %129 = arith.maximumf %127, %128 : vector<8x128xf32>
    %c0_96 = arith.constant 0 : index
    %c0_97 = arith.constant 0 : index
    %130 = vector.load %arg34[%c0_96, %c0_97] : memref<128x6xf32, #tpu.memory_space<vmem>>, vector<128x6xf32>
    %cst_98 = arith.constant dense<0.000000e+00> : vector<8x6xf32>
    %131 = tpu.matmul %129, %130, %cst_98 {dimension_numbers = #tpu.dot_dimension_numbers<[1], [0], [0], [1], [0, 0, 1, 1], [], []>} : vector<8x128xf32>, vector<128x6xf32>, vector<8x6xf32> -> vector<8x6xf32>
    %c0_99 = arith.constant 0 : index
    %c0_100 = arith.constant 0 : index
    %132 = vector.load %arg35[%c0_99, %c0_100] : memref<1x6xf32, #tpu.memory_space<vmem>>, vector<1x6xf32>
    %133 = vector.broadcast %132 : vector<1x6xf32> to vector<8x6xf32>
    %134 = arith.addf %131, %133 : vector<8x6xf32>
    %c0_101 = arith.constant 0 : index
    %c0_102 = arith.constant 0 : index
    %135 = vector.load %arg36[%c0_101, %c0_102] : memref<8x6xf32, #tpu.memory_space<vmem>>, vector<8x6xf32>
    tpu.vector_store %arg36[%c0_101, %c0_102], %134 {strides = array<i32>} : memref<8x6xf32, #tpu.memory_space<vmem>>, vector<8x6xf32>,
    %c0_103 = arith.constant 0 : index
    %c0_104 = arith.constant 0 : index
    %136 = vector.load %arg37[%c0_103, %c0_104] : memref<8x32xf32, #tpu.memory_space<vmem>>, vector<8x32xf32>
    tpu.vector_store %arg37[%c0_103, %c0_104], %61 {strides = array<i32>} : memref<8x32xf32, #tpu.memory_space<vmem>>, vector<8x32xf32>,
    %c0_105 = arith.constant 0 : index
    %c0_106 = arith.constant 0 : index
    %137 = vector.load %arg38[%c0_105, %c0_106] : memref<8x32xf32, #tpu.memory_space<vmem>>, vector<8x32xf32>
    tpu.vector_store %arg38[%c0_105, %c0_106], %62 {strides = array<i32>} : memref<8x32xf32, #tpu.memory_space<vmem>>, vector<8x32xf32>,
    %c0_107 = arith.constant 0 : index
    %c0_108 = arith.constant 0 : index
    %138 = vector.load %arg39[%c0_107, %c0_108] : memref<16x32xf32, #tpu.memory_space<vmem>>, vector<16x32xf32>
    tpu.vector_store %arg39[%c0_107, %c0_108], %63 {strides = array<i32>} : memref<16x32xf32, #tpu.memory_space<vmem>>, vector<16x32xf32>,
    %c0_109 = arith.constant 0 : index
    %c0_110 = arith.constant 0 : index
    %139 = vector.load %arg40[%c0_109, %c0_110] : memref<16x32xf32, #tpu.memory_space<vmem>>, vector<16x32xf32>
    tpu.vector_store %arg40[%c0_109, %c0_110], %64 {strides = array<i32>} : memref<16x32xf32, #tpu.memory_space<vmem>>, vector<16x32xf32>,
    %c0_111 = arith.constant 0 : index
    %c0_112 = arith.constant 0 : index
    %140 = vector.load %arg41[%c0_111, %c0_112] : memref<1x32xf32, #tpu.memory_space<vmem>>, vector<1x32xf32>
    tpu.vector_store %arg41[%c0_111, %c0_112], %65 {strides = array<i32>} : memref<1x32xf32, #tpu.memory_space<vmem>>, vector<1x32xf32>,
    %c0_113 = arith.constant 0 : index
    %c0_114 = arith.constant 0 : index
    %141 = vector.load %arg42[%c0_113, %c0_114] : memref<1x32xf32, #tpu.memory_space<vmem>>, vector<1x32xf32>
    tpu.vector_store %arg42[%c0_113, %c0_114], %66 {strides = array<i32>} : memref<1x32xf32, #tpu.memory_space<vmem>>, vector<1x32xf32>,
    return
  }
  func.func @transform_0(%arg0: i32) -> (i32, i32) {
    %c0_i32 = arith.constant 0 : i32
    %c0_i32_0 = arith.constant 0 : i32
    %c0_i32_1 = arith.constant 0 : i32
    return %c0_i32, %c0_i32_0 : i32, i32
  }
  func.func @transform_1(%arg0: i32) -> (i32, i32) {
    %c0_i32 = arith.constant 0 : i32
    %c0_i32_0 = arith.constant 0 : i32
    %c0_i32_1 = arith.constant 0 : i32
    return %c0_i32, %c0_i32_0 : i32, i32
  }
  func.func @transform_2(%arg0: i32) -> (i32, i32) {
    %c0_i32 = arith.constant 0 : i32
    %c0_i32_0 = arith.constant 0 : i32
    %c0_i32_1 = arith.constant 0 : i32
    return %c0_i32, %c0_i32_0 : i32, i32
  }
  func.func @transform_3(%arg0: i32) -> (i32, i32) {
    %c0_i32 = arith.constant 0 : i32
    %c0_i32_0 = arith.constant 0 : i32
    %c0_i32_1 = arith.constant 0 : i32
    return %c0_i32, %c0_i32_0 : i32, i32
  }
  func.func @transform_4(%arg0: i32) -> (i32, i32) {
    %c0_i32 = arith.constant 0 : i32
    %c0_i32_0 = arith.constant 0 : i32
    %c0_i32_1 = arith.constant 0 : i32
    return %c0_i32, %c0_i32_0 : i32, i32
  }
  func.func @transform_5(%arg0: i32) -> (i32, i32) {
    %c0_i32 = arith.constant 0 : i32
    %c0_i32_0 = arith.constant 0 : i32
    %c0_i32_1 = arith.constant 0 : i32
    return %c0_i32, %c0_i32_0 : i32, i32
  }
  func.func @transform_6(%arg0: i32) -> (i32, i32) {
    %c0_i32 = arith.constant 0 : i32
    %c0_i32_0 = arith.constant 0 : i32
    %c0_i32_1 = arith.constant 0 : i32
    return %c0_i32, %c0_i32_0 : i32, i32
  }
  func.func @transform_7(%arg0: i32) -> (i32, i32) {
    %c0_i32 = arith.constant 0 : i32
    %c0_i32_0 = arith.constant 0 : i32
    %c0_i32_1 = arith.constant 0 : i32
    return %c0_i32, %c0_i32_0 : i32, i32
  }
  func.func @transform_8(%arg0: i32) -> (i32, i32) {
    %c0_i32 = arith.constant 0 : i32
    %c0_i32_0 = arith.constant 0 : i32
    %c0_i32_1 = arith.constant 0 : i32
    return %c0_i32, %c0_i32_0 : i32, i32
  }
  func.func @transform_9(%arg0: i32) -> (i32, i32) {
    %c0_i32 = arith.constant 0 : i32
    %c0_i32_0 = arith.constant 0 : i32
    %c0_i32_1 = arith.constant 0 : i32
    return %c0_i32, %c0_i32_0 : i32, i32
  }
  func.func @transform_10(%arg0: i32) -> (i32, i32) {
    %c0_i32 = arith.constant 0 : i32
    %c0_i32_0 = arith.constant 0 : i32
    %c0_i32_1 = arith.constant 0 : i32
    return %c0_i32, %c0_i32_0 : i32, i32
  }
  func.func @transform_11(%arg0: i32) -> (i32, i32) {
    %c0_i32 = arith.constant 0 : i32
    %c0_i32_0 = arith.constant 0 : i32
    %c0_i32_1 = arith.constant 0 : i32
    return %c0_i32, %c0_i32_0 : i32, i32
  }
  func.func @transform_12(%arg0: i32) -> (i32, i32) {
    %c0_i32 = arith.constant 0 : i32
    %c0_i32_0 = arith.constant 0 : i32
    %c0_i32_1 = arith.constant 0 : i32
    return %c0_i32, %c0_i32_0 : i32, i32
  }
  func.func @transform_13(%arg0: i32) -> (i32, i32) {
    %c0_i32 = arith.constant 0 : i32
    %c0_i32_0 = arith.constant 0 : i32
    %c0_i32_1 = arith.constant 0 : i32
    return %c0_i32, %c0_i32_0 : i32, i32
  }
  func.func @transform_14(%arg0: i32) -> (i32, i32) {
    %c0_i32 = arith.constant 0 : i32
    %c0_i32_0 = arith.constant 0 : i32
    %c0_i32_1 = arith.constant 0 : i32
    return %c0_i32, %c0_i32_0 : i32, i32
  }
  func.func @transform_15(%arg0: i32) -> (i32, i32) {
    %c0_i32 = arith.constant 0 : i32
    %c0_i32_0 = arith.constant 0 : i32
    %c0_i32_1 = arith.constant 0 : i32
    return %c0_i32, %c0_i32_0 : i32, i32
  }
  func.func @transform_16(%arg0: i32) -> (i32, i32) {
    %c0_i32 = arith.constant 0 : i32
    %c0_i32_0 = arith.constant 0 : i32
    %c0_i32_1 = arith.constant 0 : i32
    return %c0_i32, %c0_i32_0 : i32, i32
  }
  func.func @transform_17(%arg0: i32) -> (i32, i32) {
    %c0_i32 = arith.constant 0 : i32
    %c0_i32_0 = arith.constant 0 : i32
    %c0_i32_1 = arith.constant 0 : i32
    return %c0_i32, %c0_i32_0 : i32, i32
  }
  func.func @transform_18(%arg0: i32) -> (i32, i32) {
    %c0_i32 = arith.constant 0 : i32
    %c0_i32_0 = arith.constant 0 : i32
    %c0_i32_1 = arith.constant 0 : i32
    return %c0_i32, %c0_i32_0 : i32, i32
  }
  func.func @transform_19(%arg0: i32) -> (i32, i32) {
    %c0_i32 = arith.constant 0 : i32
    %c0_i32_0 = arith.constant 0 : i32
    %c0_i32_1 = arith.constant 0 : i32
    return %c0_i32, %c0_i32_0 : i32, i32
  }
  func.func @transform_20(%arg0: i32) -> (i32, i32) {
    %c0_i32 = arith.constant 0 : i32
    %c0_i32_0 = arith.constant 0 : i32
    %c0_i32_1 = arith.constant 0 : i32
    return %c0_i32, %c0_i32_0 : i32, i32
  }
  func.func @transform_21(%arg0: i32) -> (i32, i32) {
    %c0_i32 = arith.constant 0 : i32
    %c0_i32_0 = arith.constant 0 : i32
    %c0_i32_1 = arith.constant 0 : i32
    return %c0_i32, %c0_i32_0 : i32, i32
  }
  func.func @transform_22(%arg0: i32) -> (i32, i32) {
    %c0_i32 = arith.constant 0 : i32
    %c0_i32_0 = arith.constant 0 : i32
    %c0_i32_1 = arith.constant 0 : i32
    return %c0_i32, %c0_i32_0 : i32, i32
  }
  func.func @transform_23(%arg0: i32) -> (i32, i32) {
    %c0_i32 = arith.constant 0 : i32
    %c0_i32_0 = arith.constant 0 : i32
    %c0_i32_1 = arith.constant 0 : i32
    return %c0_i32, %c0_i32_0 : i32, i32
  }
  func.func @transform_24(%arg0: i32) -> (i32, i32) {
    %c0_i32 = arith.constant 0 : i32
    %c0_i32_0 = arith.constant 0 : i32
    %c0_i32_1 = arith.constant 0 : i32
    return %c0_i32, %c0_i32_0 : i32, i32
  }
  func.func @transform_25(%arg0: i32) -> (i32, i32) {
    %c0_i32 = arith.constant 0 : i32
    %c0_i32_0 = arith.constant 0 : i32
    %c0_i32_1 = arith.constant 0 : i32
    return %c0_i32, %c0_i32_0 : i32, i32
  }
  func.func @transform_26(%arg0: i32) -> (i32, i32) {
    %c0_i32 = arith.constant 0 : i32
    %c0_i32_0 = arith.constant 0 : i32
    %c0_i32_1 = arith.constant 0 : i32
    return %c0_i32, %c0_i32_0 : i32, i32
  }
  func.func @transform_27(%arg0: i32) -> (i32, i32) {
    %c0_i32 = arith.constant 0 : i32
    %c0_i32_0 = arith.constant 0 : i32
    %c0_i32_1 = arith.constant 0 : i32
    return %c0_i32, %c0_i32_0 : i32, i32
  }
  func.func @transform_28(%arg0: i32) -> (i32, i32) {
    %c0_i32 = arith.constant 0 : i32
    %c0_i32_0 = arith.constant 0 : i32
    %c0_i32_1 = arith.constant 0 : i32
    return %c0_i32, %c0_i32_0 : i32, i32
  }
  func.func @transform_29(%arg0: i32) -> (i32, i32) {
    %c0_i32 = arith.constant 0 : i32
    %c0_i32_0 = arith.constant 0 : i32
    %c0_i32_1 = arith.constant 0 : i32
    return %c0_i32, %c0_i32_0 : i32, i32
  }
  func.func @transform_30(%arg0: i32) -> (i32, i32) {
    %c0_i32 = arith.constant 0 : i32
    %c0_i32_0 = arith.constant 0 : i32
    %c0_i32_1 = arith.constant 0 : i32
    return %c0_i32, %c0_i32_0 : i32, i32
  }
  func.func @transform_31(%arg0: i32) -> (i32, i32) {
    %c0_i32 = arith.constant 0 : i32
    %c0_i32_0 = arith.constant 0 : i32
    %c0_i32_1 = arith.constant 0 : i32
    return %c0_i32, %c0_i32_0 : i32, i32
  }
  func.func @transform_32(%arg0: i32) -> (i32, i32) {
    %c0_i32 = arith.constant 0 : i32
    %c0_i32_0 = arith.constant 0 : i32
    %c0_i32_1 = arith.constant 0 : i32
    return %c0_i32, %c0_i32_0 : i32, i32
  }
  func.func @transform_33(%arg0: i32) -> (i32, i32) {
    %c0_i32 = arith.constant 0 : i32
    %c0_i32_0 = arith.constant 0 : i32
    %c0_i32_1 = arith.constant 0 : i32
    return %c0_i32, %c0_i32_0 : i32, i32
  }
  func.func @transform_34(%arg0: i32) -> (i32, i32) {
    %c0_i32 = arith.constant 0 : i32
    %c0_i32_0 = arith.constant 0 : i32
    %c0_i32_1 = arith.constant 0 : i32
    return %c0_i32, %c0_i32_0 : i32, i32
  }
  func.func @transform_35(%arg0: i32) -> (i32, i32) {
    %c0_i32 = arith.constant 0 : i32
    %c0_i32_0 = arith.constant 0 : i32
    %c0_i32_1 = arith.constant 0 : i32
    return %c0_i32, %c0_i32_0 : i32, i32
  }
  func.func @transform_36(%arg0: i32) -> (i32, i32) {
    %c0_i32 = arith.constant 0 : i32
    %c0_i32_0 = arith.constant 0 : i32
    %c0_i32_1 = arith.constant 0 : i32
    return %c0_i32, %c0_i32_0 : i32, i32
  }
  func.func @transform_37(%arg0: i32) -> (i32, i32) {
    %c0_i32 = arith.constant 0 : i32
    %c0_i32_0 = arith.constant 0 : i32
    %c0_i32_1 = arith.constant 0 : i32
    return %c0_i32, %c0_i32_0 : i32, i32
  }
  func.func @transform_38(%arg0: i32) -> (i32, i32) {
    %c0_i32 = arith.constant 0 : i32
    %c0_i32_0 = arith.constant 0 : i32
    %c0_i32_1 = arith.constant 0 : i32
    return %c0_i32, %c0_i32_0 : i32, i32
  }
  func.func @transform_39(%arg0: i32) -> (i32, i32) {
    %c0_i32 = arith.constant 0 : i32
    %c0_i32_0 = arith.constant 0 : i32
    %c0_i32_1 = arith.constant 0 : i32
    return %c0_i32, %c0_i32_0 : i32, i32
  }
  func.func @transform_40(%arg0: i32) -> (i32, i32) {
    %c0_i32 = arith.constant 0 : i32
    %c0_i32_0 = arith.constant 0 : i32
    %c0_i32_1 = arith.constant 0 : i32
    return %c0_i32, %c0_i32_0 : i32, i32
  }
  func.func @transform_41(%arg0: i32) -> (i32, i32) {
    %c0_i32 = arith.constant 0 : i32
    %c0_i32_0 = arith.constant 0 : i32
    %c0_i32_1 = arith.constant 0 : i32
    return %c0_i32, %c0_i32_0 : i32, i32
  }
}

</mosaic_0001>

<bundles_post_ra>
// kernel: physics_vae_forward.3
= control target key start
LH: loop header
LB: loop body
LE: loop exit
PB: predicated region body
PF: predicated region fallthrough
CT: control target
= control target key end

     0   :  { %s3070_s6 = smov 1   ;;  %s3071_s10 = smov 2   ;;  %s3652_s0 = inlined_call_operand.smem [shape: u32[42], index: -1, kind: input, shape index: {}] }
   0x1   :  { %s3135_s5 = sld [smem:[%s3652_s0]]   ;;  %s3072_s14 = smov 3  }
   0x2   :  { %s3140_s9 = sld [smem:[%s3652_s0 + %s3070_s6]]   ;;  %s3073_s18 = smov 4  }
   0x3   :  { %s3145_s13 = sld [smem:[%s3652_s0 + %s3071_s10]]   ;;  %s3074_s22 = smov 5  }
   0x4   :  { %s3150_s17 = sld [smem:[%s3652_s0 + %s3072_s14]]   ;;  %s3075_s26 = smov 6  }
   0x5   :  { %s3155_s21 = sld [smem:[%s3652_s0 + %s3073_s18]]   ;;  %s3076_s30 = smov 7  }
   0x6   :  { %s3160_s25 = sld [smem:[%s3652_s0 + %s3074_s22]]   ;;  %s3077_s4 = smov 8  }
   0x7   :  { %s3165_s29 = sld [smem:[%s3652_s0 + %s3075_s26]]   ;;  %s3078_s10 = smov 9  }
   0x8   :  { %s3170_s3 = sld [smem:[%s3652_s0 + %s3076_s30]]   ;;  %s3079_s15 = smov 10  }
   0x9   :  { %3664 = sst [smem:[#allocation17_spill]] %s3145_s13  ;;  %s3080_s20 = smov 11  }
   0xa   :  { %s3175_s8 = sld [smem:[%s3652_s0 + %s3077_s4]]   ;;  %s3081_s26 = smov 12  }
   0xb   :  { %s3180_s14 = sld [smem:[%s3652_s0 + %s3078_s10]]   ;;  %s3082_s1 = smov 13  }
   0xc   :  { %3665 = sst [smem:[#allocation18_spill]] %s3160_s25  ;;  %s3083_s7 = smov 14  }
   0xd   :  { %3666 = sst [smem:[#allocation19_spill]] %s3165_s29  ;;  %s3085_s22 = smov 16  }
   0xe   :  { %3667 = sst [smem:[#allocation20_spill]] %s3170_s3  ;;  %s3086_s28 = smov 17  }
   0xf   :  { %s3185_s19 = sld [smem:[%s3652_s0 + %s3079_s15]]   ;;  %s3084_s15 = smov 15  }
  0x10   :  { %s3190_s24 = sld [smem:[%s3652_s0 + %s3080_s20]]  }
  0x11   :  { %s3195_s30 = sld [smem:[%s3652_s0 + %s3081_s26]]  }
  0x12   :  { %s3200_s6 = sld [smem:[%s3652_s0 + %s3082_s1]]  }
  0x13   :  { %s3205_s12 = sld [smem:[%s3652_s0 + %s3083_s7]]   ;;  %s3087_s7 = smov 18  }
  0x14   :  { %s3210_s20 = sld [smem:[%s3652_s0 + %s3084_s15]]   ;;  %s3088_s15 = smov 19  }
  0x15   :  { %s3215_s27 = sld [smem:[%s3652_s0 + %s3085_s22]]   ;;  %s3089_s22 = smov 20  }
  0x16   :  { %s3220_s4 = sld [smem:[%s3652_s0 + %s3086_s28]]   ;;  %s3090_s28 = smov 21  }
  0x17   :  { %s3225_s25 = sld [smem:[%s3652_s0 + %s3087_s7]]   ;;  %s3091_s7 = smov 22  }
  0x18   :  { %s3230_s13 = sld [smem:[%s3652_s0 + %s3088_s15]]   ;;  %s3092_s15 = smov 23  }
  0x19   :  { %3668 = sst [smem:[#allocation21_spill]] %s3205_s12 }
  0x1a   :  { %s3235_s3 = sld [smem:[%s3652_s0 + %s3089_s22]]   ;;  %s3093_s22 = smov 24  }
  0x1b   :  { %s3240_s29 = sld [smem:[%s3652_s0 + %s3090_s28]]   ;;  %s3094_s28 = smov 25  }
  0x1c   :  { %s3250_s12 = sld [smem:[%s3652_s0 + %s3092_s15]]   ;;  %s3096_s15 = smov 27  }
  0x1d   :  { %3669 = sst [smem:[#allocation22_spill]] %s3225_s25 }
  0x1e   :  { %s3245_s25 = sld [smem:[%s3652_s0 + %s3091_s7]]   ;;  %s3095_s7 = smov 26  }
  0x20   :  { %3670 = sst [smem:[#allocation23_spill]] %s3235_s3 }
  0x21   :  { %3671 = sst [smem:[#allocation24_spill]] %s3240_s29 }
  0x22   :  { %3673 = sst [smem:[#allocation26_spill]] %s3250_s12 }
  0x23   :  { %s3255_s3 = sld [smem:[%s3652_s0 + %s3093_s22]]   ;;  %s3097_s22 = smov 28  }
  0x24   :  { %3672 = sst [smem:[#allocation25_spill]] %s3245_s25 }
  0x25   :  { %s3260_s29 = sld [smem:[%s3652_s0 + %s3094_s28]]   ;;  %s3098_s28 = smov 29  }
  0x26   :  { %s3265_s25 = sld [smem:[%s3652_s0 + %s3095_s7]]   ;;  %s3099_s7 = smov 30  }
  0x27   :  { %s3270_s12 = sld [smem:[%s3652_s0 + %s3096_s15]]   ;;  %s3100_s15 = smov 31  }
  0x29   :  { %3674 = sst [smem:[#allocation27_spill]] %s3255_s3 }
  0x2a   :  { %s3275_s3 = sld [smem:[%s3652_s0 + %s3097_s22]]   ;;  %s3101_s22 = smov 32  }
  0x2b   :  { %3675 = sst [smem:[#allocation28_spill]] %s3260_s29 }
  0x2c   :  { %3676 = sst [smem:[#allocation29_spill]] %s3265_s25 }
  0x2d   :  { %3677 = sst [smem:[#allocation30_spill]] %s3270_s12 }
  0x2e   :  { %s3280_s29 = sld [smem:[%s3652_s0 + %s3098_s28]]   ;;  %s3102_s28 = smov 33  }
  0x2f   :  { %s3285_s25 = sld [smem:[%s3652_s0 + %s3099_s7]]   ;;  %s3103_s7 = smov 34  }
  0x30   :  { %3678 = sst [smem:[#allocation31_spill]] %s3275_s3 }
  0x31   :  { %s3290_s12 = sld [smem:[%s3652_s0 + %s3100_s15]]   ;;  %s3104_s15 = smov 35  }
  0x32   :  { %s3295_s3 = sld [smem:[%s3652_s0 + %s3101_s22]]   ;;  %s3105_s22 = smov 36  }
  0x34   :  { %3679 = sst [smem:[#allocation32_spill]] %s3280_s29 }
  0x35   :  { %3680 = sst [smem:[#allocation33_spill]] %s3285_s25 }
  0x36   :  { %s3300_s29 = sld [smem:[%s3652_s0 + %s3102_s28]]   ;;  %s3106_s28 = smov 37  }
  0x37   :  { %3681 = sst [smem:[#allocation34_spill]] %s3290_s12 }
  0x38   :  { %3682 = sst [smem:[#allocation35_spill]] %s3295_s3 }
  0x39   :  { %s3305_s25 = sld [smem:[%s3652_s0 + %s3103_s7]]   ;;  %s3107_s7 = smov 38  }
  0x3a   :  { %s3310_s12 = sld [smem:[%s3652_s0 + %s3104_s15]]   ;;  %s3108_s15 = smov 39  }
  0x3b   :  { %s3315_s3 = sld [smem:[%s3652_s0 + %s3105_s22]]   ;;  %s3109_s22 = smov 40  }
  0x3c   :  { %3683 = sst [smem:[#allocation36_spill]] %s3300_s29 }
  0x3d   :  { %s3320_s29 = sld [smem:[%s3652_s0 + %s3106_s28]]   ;;  %s3110_s28 = smov 41  }
  0x3f   :  { %3684 = sst [smem:[#allocation37_spill]] %s3305_s25 }
  0x40   :  { %3685 = sst [smem:[#allocation38_spill]] %s3310_s12 }
  0x41   :  { %3686 = sst [smem:[#allocation39_spill]] %s3315_s3 }
  0x42   :  { %s3325_s25 = sld [smem:[%s3652_s0 + %s3107_s7]]  }
  0x43   :  { %3687 = sst [smem:[#allocation40_spill]] %s3320_s29 }
  0x44   :  { %s3330_s12 = sld [smem:[%s3652_s0 + %s3108_s15]]  }
  0x45   :  { %s3335_s3 = sld [smem:[%s3652_s0 + %s3109_s22]]  }
  0x46   :  { %s3340_s29 = sld [smem:[%s3652_s0 + %s3110_s28]]  }
  0x47   :  { %89 = vsyncpa [#allocation3], 0 }
  0x48   :  { %90 = vsyncpa [#allocation5], 0 }
  0x49   :  { %91 = vsyncpa [#allocation8], 0  ;;  %v204_v0 = vld [vmem:[%s3175_s8] sm:$0xff]  ;;  %v205_v1 = vld [vmem:[%s3175_s8 + $0x8] sm:$0xf]  ;;  %vm217_vm0 = vcmask 1043456  }
  0x4a   :  { %v3111_v2 = vmov 0.0|0.0   ;;  %v2699_v3 = vpack.c.bf16 %v205_v1, %v204_v0  ;;  %vm3112_vm1 = vmmov 1   ;;  %v179_v4 = vld [vmem:[%s3140_s9] sm:$0xff]  ;;  %vm3113_vm3 = vmmov 0  }
  0x4b   :  { %2698 = vmatprep.subr.bf16.mxu0 %v3111_v2  ;;  %vm2700_vm2 = vmpackc.low %vm217_vm0, %vm3112_vm1  ;;  %v3114_v5 = vmov 0.0   ;;  %v165_v6 = vld [vmem:[%s3135_s5] sm:$0xff]  ;;  %vm213_vm4 = vcmask 97280   ;;  %v3115_v8 = vmov 0  }
  0x4c   :  { %2462 = vmatprep.mubr.msk.f32.mxu0 %vm3113_vm3, %v3114_v5  ;;  %2701 = vmatpush3.bf16.msk.msra.mxu0 %vm2700_vm2, %v2699_v3  ;;  %v203_v7 = vld [vmem:[%s3150_s17] sm:$0xff] }
  0x4d   :  { %2898 = vset.pattern.permute.xlu0 %v3115_v8 }
  0x4e   :  { %92 = vsyncpa [#allocation11], 0  ;;  %182 = vperm.xlu0 %2898, %v179_v4   ;;  %2899 = vset.pattern.permute.xlu1 %v3115_v8  ;;  %v180_v9 = vld [vmem:[%s3140_s9 + $0x8] sm:$0xff]  ;;  %v163_v11 = vlaneseq  ;;  %vm292_vm5 = vcmask 64512   ;;  %v2296_v17 = vld [vmem:[%s3180_s14] ss:$0 sm:$0xff] }
  0x4f   :  { %168 = vperm.xlu1 %2899, %v165_v6   ;;  %2463 = vmatmul.mubr.msk.f32.vlgmr.msra.gmra.mrb[0].mxu0 %vm213_vm4, %v203_v7  ;;  %v166_v10 = vld [vmem:[%s3135_s5 + $0x8] sm:$0xff]  ;;  %v725_v23 = vld [vmem:[%s3210_s20] sm:$0xff]  ;;  %v727_v29 = vld [vmem:[%s3210_s20 + $0x10] sm:$0xff]  ;;  %vm463_vm10 = vcmask 261120   ;;  %s3688_s0 = sld [smem:[#allocation21_spill]]  ;;  %s3689_s5 = sld [smem:[#allocation25_spill]] }
  0x50   :  { %v164_v12 = vand.u32 127, %v163_v11  ;;  %v726_v24 = vld [vmem:[%s3210_s20 + $0x8] sm:$0xff]  ;;  %v459_v26 = vld [vmem:[%s3190_s24] sm:$0xff]  ;;  %v728_v31 = vld [vmem:[%s3210_s20 + $0x18] sm:$0xff]  ;;  %s3690_s9 = sld [smem:[#allocation24_spill]]  ;;  %s3692_s17 = sld [smem:[#allocation23_spill]] }
  0x51   :  { %v460_v27 = vld [vmem:[%s3190_s24 + $0x8] sm:$0xff]  ;;  %v2725_v28 = vpack.c.bf16 %v726_v24, %v725_v23  ;;  %v461_v32 = vld [vmem:[%s3190_s24 + $0x10] sm:$0xff]  ;;  %v462_v33 = vld [vmem:[%s3190_s24 + $0x18] sm:$0xff]  ;;  %v2728_v36 = vpack.c.bf16 %v728_v31, %v727_v29  ;;  %vm1193_vm11 = vcmask 1045504   ;;  %s3694_s8 = sld [smem:[#allocation27_spill]]  ;;  %vm2143_vm12 = vcmask 253952  }
  0x52   :  { %185 = vperm.xlu0 %2898, %v180_v9   ;;  %v2702_v35 = vpack.c.bf16 %v460_v27, %v459_v26  ;;  %v2706_v37 = vpack.c.bf16 %v462_v33, %v461_v32  ;;  %v455_v38 = vld [vmem:[%s3185_s19] sm:$0xff]  ;;  %v456_v39 = vld [vmem:[%s3185_s19 + $0x8] sm:$0xff]  ;;  %v457_v44 = vld [vmem:[%s3185_s19 + $0x10] sm:$0xff]  ;;  %vm1186_vm13 = vcmask 48128   ;;  %s3695_s14 = sld [smem:[#allocation29_spill]]  ;;  %s3696_s24 = sld [smem:[#allocation19_spill]] }
  0x53   :  { %171 = vperm.xlu1 %2899, %v166_v10   ;;  %v2710_v40 = vpack.c.bf16 %v456_v39, %v455_v38  ;;  %v458_v45 = vld [vmem:[%s3185_s19 + $0x18] sm:$0xff]  ;;  %v646_v52 = vld [vmem:[%s3200_s6] sm:$0xff]  ;;  %v647_v53 = vld [vmem:[%s3200_s6 + $0x8] sm:$0xff]  ;;  %s3117_s19 = smov 96   ;;  %s3699_s20 = sld [smem:[#allocation30_spill]]  ;;  %vm1637_vm15 = vcmask 130048  }
  0x54   :  { %v2714_v49 = vpack.c.bf16 %v458_v45, %v457_v44  ;;  %v2309_v55 = vld [vmem:[%s3215_s27] ss:$0 sm:$0xff]  ;;  %v2719_v57 = vpack.c.bf16 %v647_v53, %v646_v52  ;;  %v648_v60 = vld [vmem:[%s3200_s6 + $0x10] sm:$0xff]  ;;  %v649_v61 = vld [vmem:[%s3200_s6 + $0x18] sm:$0xff]  ;;  %s3698_s6 = sld [smem:[#allocation28_spill]]  ;;  %s3700_s27 = sld [smem:[#allocation17_spill]] }
  0x55   :  { %v809_v63 = vld [vmem:[%s3220_s4] sm:$0xff]  ;;  %v810_v0 = vld [vmem:[%s3220_s4 + $0x8] sm:$0xff]  ;;  %v2722_v1 = vpack.c.bf16 %v649_v61, %v648_v60  ;;  %v811_v7 = vld [vmem:[%s3220_s4 + $0x10] sm:$0xff]  ;;  %s3702_s7 = sld [smem:[#allocation36_spill]]  ;;  %s3703_s10 = sld [smem:[#allocation31_spill]] }
  0x56   :  { %v2730_v4 = vpack.c.bf16 %v810_v0, %v809_v63  ;;  %v812_v8 = vld [vmem:[%s3220_s4 + $0x18] sm:$0xff]  ;;  %v901_v10 = vld [vmem:[%s3230_s13] sm:$0xff]  ;;  %v3480_v0 = vshrl.u32 %v163_v11, 7  ;;  %s3701_s4 = sld [smem:[#allocation32_spill]]  ;;  %s3704_s11 = sld [smem:[#allocation33_spill]] }
  0x57   :  { %v2734_v9 = vpack.c.bf16 %v812_v8, %v811_v7  ;;  %v650_v27 = vld [vmem:[%s3688_s0] sm:$0x1]  ;;  %v1445_v61 = vld [vmem:[%s3694_s8 + $0x10] sm:$0xff]  ;;  %s3705_s15 = sld [smem:[#allocation18_spill]]  ;;  %s3707_s18 = sld [smem:[#allocation35_spill]] }
  0x58   :  { %s3706_s16 = sld [smem:[#allocation34_spill]]  ;;  %s3118_s22 = smov [#allocation4]  }
  0x59   :  { %s2166_s23 = sshll.u32 %s3118_s22, 4  ;;  %s3119_s26 = smov [#allocation7]   ;;  %s2167_s23 = int_to_ptr.vmem [resolvable:$true] %s2166_s23 }
  0x5a   :  { %s2185_s28 = sshll.u32 %s3119_s26, 4  ;;  %s2908_s1 = scalar_lea.vmem %s2167_s23, 128  ;;  %s3602_s28 = int_to_ptr.vmem [resolvable:$true] %s2185_s28 }
  0x5b   :  { %p2909_p0 = scmp.ne.s32.totalorder %s2167_s23, %s2908_s1  ;;  %p2913_p1 = scmp.lt.s32.totalorder %s2167_s23, %s2167_s23 }
  0x5c   :  { %p2914_p2 = scmp.lt.s32.totalorder %s2908_s1, %s2908_s1 }
  0x5e   :  { %p2915_p3 = por %p2914_p2, %p2913_p1 }
  0x60   :  { %p2916_p4 = pnand %p2915_p3, %p2909_p0 }
  0xcd   :  { %v183_v13 = vpop.permute.xlu0 %182 }
  0xce   :  { %vm187_vm6 = vcmp.eq.s32.totalorder %v164_v12, %v183_v13  ;;  %v169_v14 = vpop.permute.xlu1 %168 }
  0xcf   :  { %vm173_vm7 = vcmp.eq.s32.totalorder %v164_v12, %v169_v14  ;;  %v3354_v15 = vsel %vm187_vm6, 1.0, %v3114_v5  ;;  %v903_v14 = vld [vmem:[%s3230_s13 + $0x10] sm:$0xff] }
  0xd0   :  { %v3357_v16 = vsel %vm173_vm7, 1.0, %v3114_v5  ;;  %2472 = vmatprep.mubr.msk.f32.mxu1 %vm292_vm5, %v3354_v15 }
  0xd1   :  { %2467 = vmatprep.mubr.msk.f32.mxu0 %vm292_vm5, %v3357_v16  ;;  %v186_v20 = vpop.permute.xlu0 %185 }
  0xd2   :  { %v172_v18 = vpop.permute.xlu1 %171  ;;  %vm188_vm9 = vcmp.eq.s32.totalorder %v164_v12, %v186_v20  ;;  %v2307_v20 = vld [vmem:[%s3195_s30] ss:$0 sm:$0xff]  ;;  %s3697_s30 = sld [smem:[#allocation20_spill]] }
  0xd3   :  { %vm174_vm8 = vcmp.eq.s32.totalorder %v164_v12, %v172_v18  ;;  %v3376_v34 = vsel %vm188_vm9, 1.0, %v3114_v5  ;;  %v902_v12 = vld [vmem:[%s3230_s13 + $0x8] sm:$0xff] }
  0xd4   :  { %v3370_v30 = vsel %vm174_vm8, 1.0, %v3114_v5  ;;  %v2739_v13 = vpack.c.bf16 %v902_v12, %v901_v10 }
 0x122   :  { %v287_v19 = vpop.f32.mrb[0].mxu0 }
 0x123   :  { %v288_v21 = vadd.f32 %v2296_v17, %v287_v19  ;;  %v2464_v22 = vpop.f32.mrb[1].mxu0  ;;  %v904_v17 = vld [vmem:[%s3230_s13 + $0x18] sm:$0xff]  ;;  %v3423_v19 = vld [vmem:[%s3155_s21] sm:$0xff]  ;;  %s3691_s13 = sld [smem:[#allocation22_spill]]  ;;  %s3693_s21 = sld [smem:[#allocation26_spill]] }
 0x124   :  { %v2742_v18 = vpack.c.bf16 %v904_v17, %v903_v14  ;;  %v1537_v14 = vld [vmem:[%s3695_s14] sm:$0xff]  ;;  %v1538_v17 = vld [vmem:[%s3695_s14 + $0x8] sm:$0xff] }
 0x125   :  { %v291_v25 = vmax.f32 %v288_v21, 0.0 }
 0x127   :  { %2465 = vmatprep.subr.mxu0 %v291_v25  ;;  %2470 = vmatprep.subr.mxu1 %v291_v25  ;;  %v637_v41 = vsel %vm463_vm10, %v291_v25, 0.0 }
 0x128   :  { %2466 = vmatpush3.msra.mxu0 %v291_v25  ;;  %2471 = vmatpush3.msra.mxu1 %v291_v25  ;;  %v638_v42 = vrot.slane %v637_v41, 4 }
 0x129   :  { %2724 = vmatprep.subr.bf16.mxu1 %v3111_v2  ;;  %2473 = vmatmul.mubr.msk.f32.vlgmr.msra.gmra.mrb[0].mxu1 %vm292_vm5, %v3376_v34 }
 0x12a   :  { %2726 = vmatpush3.bf16.msra.mxu1 %v2725_v28  ;;  %2468 = vmatmul.mubr.msk.f32.vlgmr.msra.gmra.mrb[2].mxu0 %vm292_vm5, %v3370_v30  ;;  %v639_v43 = vadd.f32 %v638_v42, %v637_v41 }
 0x12b   :  { %2727 = vmatprep.subr.bf16.mxu1 %v3111_v2  ;;  %2516 = vmatprep.mubr.msk.f32.mxu1 %vm3113_vm3, %v3114_v5 }
 0x12c   :  { %2703 = vmatprep.subr.bf16.mxu0 %v2702_v35  ;;  %v640_v50 = vrot.slane %v639_v43, 2 }
 0x12d   :  { %2705 = vmatpush3.bf16.msra.mxu0 %v2702_v35 }
 0x12e   :  { %2729 = vmatpush3.bf16.msra.mxu1 %v2728_v36  ;;  %2707 = vmatprep.subr.bf16.mxu0 %v2706_v37  ;;  %v641_v54 = vadd.f32 %v640_v50, %v639_v43  ;;  %v1443_v50 = vld [vmem:[%s3694_s8] sm:$0xff] }
 0x12f   :  { %2738 = vmatprep.subr.bf16.mxu1 %v3111_v2 }
 0x130   :  { %v642_v62 = vrot.slane %v641_v54, 1 }
 0x131   :  { %2517 = vmatmul.mubr.msk.f32.vlgmr.msra.gmra.mrb[2].mxu1 %vm463_vm10, %v291_v25  ;;  %2709 = vmatpush3.bf16.msra.mxu0 %v2706_v37 }
 0x132   :  { %2538 = vmatprep.mubr.msk.f32.mxu1 %vm3113_vm3, %v3114_v5  ;;  %2711 = vmatprep.subr.bf16.mxu0 %v2710_v40  ;;  %v643_v3 = vadd.f32 %v642_v62, %v641_v54  ;;  %v1446_v62 = vld [vmem:[%s3694_s8 + $0x18] sm:$0xff] }
 0x133   :  { %2740 = vmatpush3.bf16.msra.mxu1 %v2739_v13  ;;  %v2756_v63 = vpack.c.bf16 %v1446_v62, %v1445_v61 }
 0x134   :  { %v645_v6 = vmul.f32 0.125, %v643_v3  ;;  %2741 = vmatprep.subr.bf16.mxu1 %v3111_v2  ;;  %v1358_v3 = vld [vmem:[%s3693_s21 + $0x10] sm:$0xff] }
 0x137   :  { %2743 = vmatpush3.bf16.msra.mxu1 %v2742_v18  ;;  %v2758_v18 = vpack.c.bf16 %v1538_v17, %v1537_v14  ;;  %v2294_v17 = vld [vmem:[%s3700_s27] ss:$0 sm:$0xff] }
 0x138   :  { %2546 = vmatprep.subr.mxu1 %v3423_v19  ;;  %vm200_vm14 = vcmp.eq.s32.totalorder %v3480_v0, %v2294_v17 }
 0x1fc   :  { %v2474_v46 = vpop.f32.mrb[0].mxu1 }
 0x1fd   :  { %v446_v47 = vpop.f32.mrb[1].mxu1  ;;  %v2469_v48 = vpop.f32.mrb[2].mxu0 }
 0x1fe   :  { %2483 = vmatprep.mubr.msk.f32.mxu0 %vm463_vm10, %v446_v47  ;;  %v365_v51 = vpop.f32.mrb[3].mxu0  ;;  %v1356_v47 = vld [vmem:[%s3693_s21] sm:$0xff] }
 0x1ff   :  { %2484 = vmatmul.mubr.msk.f32.vlgmr.msra.gmra.mrb[4].mxu0 %vm463_vm10, %v2474_v46 }
 0x200   :  { %2713 = vmatpush3.bf16.msra.mxu0 %v2710_v40  ;;  %2494 = vmatprep.mubr.msk.f32.mxu0 %vm463_vm10, %v365_v51  ;;  %v905_v40 = vld [vmem:[%s3692_s17] sm:$0x1]  ;;  %v1444_v51 = vld [vmem:[%s3694_s8 + $0x8] sm:$0xff] }
 0x201   :  { %2715 = vmatprep.subr.bf16.mxu0 %v2714_v49  ;;  %v2753_v53 = vpack.c.bf16 %v1444_v51, %v1443_v50  ;;  %v1549_v51 = vld [vmem:[%s3695_s14 + $0x60] sm:$0xff] }
 0x204   :  { %2717 = vmatpush3.bf16.msra.mxu0 %v2714_v49  ;;  %v805_v56 = vpop.f32.mrb[2].mxu1 }
 0x205   :  { %v3401_v58 = vadd.f32 %v2309_v55, %v805_v56  ;;  %v2518_v59 = vpop.f32.mrb[3].mxu1  ;;  %2718 = vmatprep.subr.bf16.mxu0 %v3111_v2 }
 0x207   :  { %2125 = vst.msk [vmem:[#allocation4] sm:$0xff] %vm463_vm10, %v3401_v58  ;;  %2495 = vmatmul.mubr.msk.f32.vlgmr.msra.gmra.mrb[4].mxu0 %vm463_vm10, %v2469_v48  ;;  %v1357_v48 = vld [vmem:[%s3693_s21 + $0x8] sm:$0xff]  ;;  %v980_v60 = vmul.f32 0.5, %v3401_v58 }
 0x208   :  { %2720 = vmatpush3.bf16.msra.mxu0 %v2719_v57  ;;  %2505 = vmatprep.mubr.msk.f32.mxu0 %vm3113_vm3, %v3114_v5  ;;  %v2744_v56 = vpack.c.bf16 %v1357_v48, %v1356_v47  ;;  %v3116_v57 = vmov 1966171168   ;;  %v1547_v48 = vld [vmem:[%s3695_s14 + $0x50] sm:$0xff] }
 0x209   :  { %2721 = vmatprep.subr.bf16.mxu0 %v3111_v2  ;;  %v1015_v59 = vunpack.c.l.s4 %v3116_v57 }
 0x20c   :  { %2723 = vmatpush3.bf16.msra.mxu0 %v2722_v1  ;;  %v1016_v1 = vunpack.c.0.s8 %v1015_v59 }
 0x20d   :  { %2731 = vmatprep.subr.bf16.mxu0 %v2730_v4 }
 0x20f   :  { %2506 = vmatmul.mubr.msk.f32.vlgmr.msra.gmra.mrb[6].mxu0 %vm463_vm10, %v645_v6  ;;  %v981_v6 = vmul.f32 1.442695, %v980_v60  ;;  %v1522_v60 = vsub.s32 0, %v3480_v0 }
 0x210   :  { %2733 = vmatpush3.bf16.msra.mxu0 %v2730_v4  ;;  %v1359_v4 = vld [vmem:[%s3693_s21 + $0x18] sm:$0xff] }
 0x211   :  { %2735 = vmatprep.subr.bf16.mxu0 %v2734_v9  ;;  %v2748_v8 = vpack.c.bf16 %v1359_v4, %v1358_v3 }
 0x214   :  { %2737 = vmatpush3.bf16.msra.mxu0 %v2734_v9  ;;  %v1019_v9 = vsub.s32 %v1016_v1, %v3480_v0  ;;  %v2328_v1 = vld [vmem:[%s3698_s6] ss:$0 sm:$0xff] }
 0x215   :  { %2541 = vmatprep.subr.mxu0 %v3423_v19 }
 0x2da   :  { %v2496_v21 = vpop.f32.mrb[4].mxu0 }
 0x2db   :  { %v634_v22 = vadd.f32 %v2496_v21, %v2307_v20  ;;  %v617_v23 = vpop.f32.mrb[5].mxu0  ;;  %v989_v21 = vld [vmem:[%s3696_s24] sm:$0xff] }
 0x2dc   :  { %v633_v24 = vadd.f32 %v2307_v20, %v617_v23 }
 0x2dd   :  { %v636_v26 = vmax.f32 %v634_v22, 0.0 }
 0x2de   :  { %v635_v25 = vmax.f32 %v633_v24, 0.0  ;;  %v990_v24 = vld [vmem:[%s3696_s24 + $0x8] sm:$0xff] }
 0x2e0   :  { %2527 = vmatprep.mubr.msk.f32.mxu0 %vm463_vm10, %v635_v25 }
 0x2e1   :  { %2528 = vmatmul.mubr.msk.f32.vlgmr.msra.gmra.mrb[8].mxu0 %vm463_vm10, %v636_v26 }
 0x2e2   :  { %v720_v28 = vpop.f32.mrb[6].mxu0  ;;  %2543 = vmatprep.mubr.msk.f32.mxu0 %vm292_vm5, %v3357_v16  ;;  %2542 = vmatpush3.msra.mxu0 %v3423_v19  ;;  %v1185_v16 = vld [vmem:[%s3689_s5] sm:$0x3f] }
 0x2e3   :  { %v721_v29 = vadd.f32 %v720_v28, %v650_v27  ;;  %v2507_v31 = vpop.f32.mrb[7].mxu0  ;;  %2551 = vmatprep.subr.msk.mxu0 %vm1193_vm11, %v1185_v16 }
 0x2e5   :  { %v724_v32 = vmax.f32 %v721_v29, 0.0  ;;  %2544 = vmatmul.mubr.msk.f32.vlgmr.msra.gmra.mrb[10].mxu0 %vm292_vm5, %v3370_v30  ;;  %v1184_v30 = vld [vmem:[%s3690_s9] sm:$0x3f] }
 0x2e6   :  { %2552 = vmatpush3.msk.msra.mxu0 %vm1193_vm11, %v1185_v16  ;;  %v1009_v29 = vld [vmem:[%s3697_s30] sm:$0x1]  ;;  %v1539_v16 = vld [vmem:[%s3695_s14 + $0x10] sm:$0xff] }
 0x2e7   :  { %2539 = vmatmul.mubr.msk.f32.vlgmr.msra.gmra.mrb[4].mxu1 %vm463_vm10, %v724_v32  ;;  %2556 = vmatprep.subr.msk.mxu0 %vm1193_vm11, %v1184_v30 }
 0x2e8   :  { %2548 = vmatprep.mubr.msk.f32.mxu1 %vm292_vm5, %v3354_v15  ;;  %2547 = vmatpush3.msra.mxu1 %v3423_v19  ;;  %v2311_v15 = vld [vmem:[%s3691_s13] ss:$0 sm:$0xff] }
 0x2e9   :  { %2752 = vmatprep.subr.bf16.mxu1 %v3111_v2 }
 0x2eb   :  { %2549 = vmatmul.mubr.msk.f32.vlgmr.msra.gmra.mrb[6].mxu1 %vm292_vm5, %v3376_v34 }
 0x2ec   :  { %2580 = vmatprep.mubr.msk.f32.mxu1 %vm3113_vm3, %v3114_v5  ;;  %2754 = vmatpush3.bf16.msra.mxu1 %v2753_v53 }
 0x2ed   :  { %2755 = vmatprep.subr.bf16.mxu1 %v3111_v2 }
 0x2f0   :  { %2757 = vmatpush3.bf16.msra.mxu1 %v2756_v63 }
 0x2f1   :  { %2759 = vmatprep.subr.bf16.mxu1 %v2758_v18 }
 0x3b4   :  { %v2529_v33 = vpop.f32.mrb[8].mxu0 }
 0x3b5   :  { %v3451_v35 = vadd.f32 %v2529_v33, %v2311_v15  ;;  %v892_v36 = vpop.f32.mrb[9].mxu0 }
 0x3b6   :  { %v3453_v34 = vadd.f32 %v2311_v15, %v892_v36 }
 0x3b7   :  { %2132 = vst.msk [vmem:[#allocation7 + $0x8] sm:$0xff] %vm463_vm10, %v3451_v35  ;;  %v992_v37 = vmul.f32 0.5, %v3451_v35 }
 0x3b8   :  { %v991_v38 = vmul.f32 0.5, %v3453_v34  ;;  %2131 = vst.msk [vmem:[#allocation7] sm:$0xff] %vm463_vm10, %v3453_v34  ;;  %v2545_v39 = vpop.f32.mrb[10].mxu0 }
 0x3b9   :  { %v1100_v41 = vpop.f32.mrb[11].mxu0  ;;  %v995_v46 = vmul.f32 1.442695, %v992_v37  ;;  %v1541_v37 = vld [vmem:[%s3695_s14 + $0x20] sm:$0xff] }
 0x3ba   :  { %v993_v42 = vmul.f32 1.442695, %v991_v38  ;;  %v975_v43 = vpop.f32.mrb[4].mxu1  ;;  %v1542_v38 = vld [vmem:[%s3695_s14 + $0x28] sm:$0xff] }
 0x3bb   :  { %v3462_v44 = vadd.f32 %v975_v43, %v905_v40  ;;  %v2540_v45 = vpop.f32.mrb[5].mxu1 }
 0x3bc   :  { %2900 = vpow2.f32 %v993_v42  ;;  %v1544_v42 = vld [vmem:[%s3695_s14 + $0x38] sm:$0xff]  ;;  %v1545_v45 = vld [vmem:[%s3695_s14 + $0x40] sm:$0xff] }
 0x3bd   :  { %v1010_v49 = vmul.f32 0.5, %v3462_v44  ;;  %2144 = vst.msk [vmem:[#allocation10] sm:$0x1] %vm2143_vm12, %v3462_v44  ;;  %2902 = vpow2.f32 %v995_v46  ;;  %v1546_v46 = vld [vmem:[%s3695_s14 + $0x48] sm:$0xff] }
 0x3be   :  { %v2550_v52 = vpop.f32.mrb[6].mxu1  ;;  %v2774_v47 = vpack.c.bf16 %v1546_v46, %v1545_v45 }
 0x3bf   :  { %v1011_v54 = vmul.f32 1.442695, %v1010_v49  ;;  %v1175_v55 = vpop.f32.mrb[7].mxu1  ;;  %v1548_v49 = vld [vmem:[%s3695_s14 + $0x58] sm:$0xff] }
 0x3c0   :  { %2553 = vmatprep.mubr.msk.f32.mxu0 %vm1186_vm13, %v1175_v55  ;;  %v2778_v50 = vpack.c.bf16 %v1548_v49, %v1547_v48  ;;  %v1552_v55 = vld [vmem:[%s3695_s14 + $0x78] sm:$0xff] }
 0x3c1   :  { %2904 = vpow2.f32 %v1011_v54  ;;  %2554 = vmatmul.mubr.msk.f32.vlgmr.msra.gmra.mrb[12].mxu0 %vm1186_vm13, %v2550_v52  ;;  %v1550_v52 = vld [vmem:[%s3695_s14 + $0x68] sm:$0xff]  ;;  %v1551_v54 = vld [vmem:[%s3695_s14 + $0x70] sm:$0xff]  ;;  %v2034_v48 = vld [vmem:[%s3702_s7 + $0x18] sm:$0xff] }
 0x3c2   :  { %2558 = vmatprep.mubr.msk.f32.mxu0 %vm1186_vm13, %v1100_v41  ;;  %2557 = vmatpush3.msk.msra.mxu0 %vm1193_vm11, %v1184_v30  ;;  %2906 = vpow2.f32 %v981_v6  ;;  %v1540_v30 = vld [vmem:[%s3695_s14 + $0x18] sm:$0xff]  ;;  %v1543_v41 = vld [vmem:[%s3695_s14 + $0x30] sm:$0xff]  ;;  %v2782_v53 = vpack.c.bf16 %v1550_v52, %v1549_v51  ;;  %v2036_v51 = vld [vmem:[%s3702_s7 + $0x28] sm:$0xff] }
 0x3c3   :  { %2745 = vmatprep.subr.bf16.mxu0 %v2744_v56  ;;  %v2762_v36 = vpack.c.bf16 %v1540_v30, %v1539_v16  ;;  %v2770_v43 = vpack.c.bf16 %v1544_v42, %v1543_v41  ;;  %v1711_v16 = vld [vmem:[%s3703_s10] sm:$0x3f] }
 0x3c4   :  { %v1865_v30 = vld [vmem:[%s3704_s11] sm:$0xff] }
 0x3c6   :  { %v2901_v7 = vpop.eup %2900 }
 0x3c7   :  { %999 = vrot.lane.b32.xlu0 %v2901_v7, %s3117_s19  ;;  %v2903_v10 = vpop.eup %2902 }
 0x3c9   :  { %2559 = vmatmul.mubr.msk.f32.vlgmr.msra.gmra.mrb[12].mxu0 %vm1186_vm13, %v2545_v39  ;;  %v2766_v39 = vpack.c.bf16 %v1542_v38, %v1541_v37  ;;  %v1867_v38 = vld [vmem:[%s3704_s11 + $0x10] sm:$0xff] }
 0x3ca   :  { %2747 = vmatpush3.bf16.msra.mxu0 %v2744_v56  ;;  %v2786_v56 = vpack.c.bf16 %v1552_v55, %v1551_v54  ;;  %v2040_v55 = vld [vmem:[%s3702_s7 + $0x48] sm:$0xff] }
 0x3cb   :  { %v2905_v11 = vpop.eup %2904  ;;  %1001 = vrot.lane.b32.xlu0 %v2903_v10, %s3117_s19  ;;  %2749 = vmatprep.subr.bf16.mxu0 %v2748_v8  ;;  %v2329_v10 = vld [vmem:[%s3699_s20] ss:$0 sm:$0xff] }
 0x3cc   :  { %v1020_v12 = vrot.slane %v2905_v11, %v1019_v9  ;;  %v2907_v20 = vpop.eup %2906 }
 0x3ce   :  { %v1027_v13 = vrot.slane %v1020_v12, %v1019_v9  ;;  %2751 = vmatpush3.bf16.msra.mxu0 %v2748_v8 }
 0x3cf   :  { %2127 = vrot.lane.b32.xlu0 %v3401_v58, %s3117_s19  ;;  %2790 = vmatprep.subr.bf16.mxu0 %v3111_v2 }
 0x3d0   :  { %1028 = vrot.lane.b32.xlu1 %v1027_v13, %s3117_s19 }
 0x3d3   :  { %2137 = vrot.lane.b32.xlu0 %v3451_v35, %s3117_s19 }
 0x3d4   :  { %984 = vrot.lane.b32.xlu1 %v2907_v20, %s3117_s19 }
 0x3d8   :  { %2135 = vrot.lane.b32.xlu1 %v3453_v34, %s3117_s19 }
 0x3dc   :  { %2146 = vrot.lane.b32.xlu1 %v3462_v44, %s3117_s19 }
 0x439   :  { %v1000_v22 = vpop.permute.xlu0 %999 }
 0x43a   :  { %v1005_v23 = vmul.f32 %v1000_v22, %v989_v21  ;;  %v1712_v21 = vld [vmem:[%s3701_s4] sm:$0xff]  ;;  %v1713_v22 = vld [vmem:[%s3701_s4 + $0x8] sm:$0xff] }
 0x43c   :  { %v1007_v25 = vadd.f32 %v1005_v23, %v3453_v34 }
 0x43d   :  { %v1002_v26 = vpop.permute.xlu0 %1001 }
 0x43e   :  { %v1006_v27 = vmul.f32 %v1002_v26, %v990_v24  ;;  %2569 = vmatprep.mubr.msk.f32.mxu0 %vm463_vm10, %v1007_v25  ;;  %v2295_v24 = vsel %vm200_vm14, 1.0, %v3114_v5  ;;  %v2794_v25 = vpack.c.bf16 %v1713_v22, %v1712_v21  ;;  %v1714_v26 = vld [vmem:[%s3701_s4 + $0x10] sm:$0xff]  ;;  %v2336_v21 = vld [vmem:[%s3707_s18] ss:$0 sm:$0xff] }
 0x440   :  { %v1008_v28 = vadd.f32 %v1006_v27, %v3451_v35  ;;  %v1715_v27 = vld [vmem:[%s3701_s4 + $0x18] sm:$0xff] }
 0x441   :  { %v2128_v31 = vpop.permute.xlu0 %2127 }
 0x442   :  { %v1029_v32 = vpop.permute.xlu1 %1028  ;;  %2130 = vst.msk [vmem:[#allocation6] sm:$0xff] %vm463_vm10, %v2128_v31  ;;  %2570 = vmatmul.mubr.msk.f32.vlgmr.msra.gmra.mrb[12].mxu0 %vm463_vm10, %v1008_v28  ;;  %v2797_v28 = vpack.c.bf16 %v1715_v27, %v1714_v26  ;;  %v2032_v31 = vld [vmem:[%s3702_s7 + $0x8] sm:$0xff] }
 0x443   :  { %v1031_v15 = vmul.f32 %v1029_v32, %v1009_v29  ;;  %2622 = vmatprep.mubr.msk.f32.mxu0 %vm3113_vm3, %v3114_v5  ;;  %v2031_v29 = vld [vmem:[%s3702_s7] sm:$0xff] }
 0x444   :  { %v2812_v32 = vpack.c.bf16 %v2032_v31, %v2031_v29 }
 0x445   :  { %v3506_v33 = vadd.f32 %v1031_v15, %v3462_v44  ;;  %v2138_v35 = vpop.permute.xlu0 %2137  ;;  %v1866_v15 = vld [vmem:[%s3704_s11 + $0x8] sm:$0xff] }
 0x446   :  { %v3508_v34 = vpop.permute.xlu1 %984  ;;  %2142 = vst.msk [vmem:[#allocation9 + $0x8] sm:$0xff] %vm463_vm10, %v2138_v35  ;;  %v2800_v37 = vpack.c.bf16 %v1866_v15, %v1865_v30 }
 0x447   :  { %2581 = vmatmul.mubr.msk.f32.vlgmr.msra.gmra.mrb[8].mxu1 %vm463_vm10, %v3506_v33 }
 0x448   :  { %2761 = vmatpush3.bf16.msra.mxu1 %v2758_v18 }
 0x449   :  { %2763 = vmatprep.subr.bf16.mxu1 %v2762_v36 }
 0x44a   :  { %v2136_v40 = vpop.permute.xlu1 %2135 }
 0x44b   :  { %2141 = vst.msk [vmem:[#allocation9] sm:$0xff] %vm463_vm10, %v2136_v40  ;;  %v979_v40 = vld [vmem:[%s3705_s15] sm:$0xff] }
 0x44c   :  { %2765 = vmatpush3.bf16.msra.mxu1 %v2762_v36  ;;  %v987_v42 = vmul.f32 %v3508_v34, %v979_v40 }
 0x44d   :  { %2767 = vmatprep.subr.bf16.mxu1 %v2766_v39 }
 0x44e   :  { %v2147_v44 = vpop.permute.xlu1 %2146  ;;  %v988_v46 = vadd.f32 %v987_v42, %v3401_v58  ;;  %v2033_v58 = vld [vmem:[%s3702_s7 + $0x10] sm:$0xff] }
 0x44f   :  { %2149 = vst.msk [vmem:[#allocation12] sm:$0x1] %vm2143_vm12, %v2147_v44  ;;  %v1944_v44 = vld [vmem:[%s3706_s16 + $0x8] sm:$0xff]  ;;  %v2815_v49 = vpack.c.bf16 %v2034_v48, %v2033_v58 }
 0x450   :  { %2769 = vmatpush3.bf16.msra.mxu1 %v2766_v39  ;;  %v1868_v39 = vld [vmem:[%s3704_s11 + $0x18] sm:$0xff] }
 0x451   :  { %2771 = vmatprep.subr.bf16.mxu1 %v2770_v43  ;;  %v2803_v41 = vpack.c.bf16 %v1868_v39, %v1867_v38 }
 0x454   :  { %2773 = vmatpush3.bf16.msra.mxu1 %v2770_v43  ;;  %v1943_v43 = vld [vmem:[%s3706_s16] sm:$0xff] }
 0x455   :  { %2775 = vmatprep.subr.bf16.mxu1 %v2774_v47  ;;  %v2806_v45 = vpack.c.bf16 %v1944_v44, %v1943_v43 }
 0x458   :  { %2777 = vmatpush3.bf16.msra.mxu1 %v2774_v47  ;;  %v1946_v47 = vld [vmem:[%s3706_s16 + $0x18] sm:$0xff] }
 0x459   :  { %2779 = vmatprep.subr.bf16.mxu1 %v2778_v50 }
 0x45c   :  { %2781 = vmatpush3.bf16.msra.mxu1 %v2778_v50  ;;  %v2035_v50 = vld [vmem:[%s3702_s7 + $0x20] sm:$0xff] }
 0x45d   :  { %2783 = vmatprep.subr.bf16.mxu1 %v2782_v53  ;;  %v2818_v52 = vpack.c.bf16 %v2036_v51, %v2035_v50 }
 0x460   :  { %2785 = vmatpush3.bf16.msra.mxu1 %v2782_v53  ;;  %v2038_v53 = vld [vmem:[%s3702_s7 + $0x38] sm:$0xff] }
 0x461   :  { %2787 = vmatprep.subr.bf16.mxu1 %v2786_v56 }
 0x464   :  { %2789 = vmatpush3.bf16.msra.mxu1 %v2786_v56 }
 0x465   :  { %2811 = vmatprep.subr.bf16.mxu1 %v3111_v2 }
 0x515   :  { %v2571_v57 = vpop.f32.mrb[12].mxu0 }
 0x516   :  { %v1432_v59 = vpop.f32.mrb[13].mxu0 }
 0x51a   :  { %v1516_v61 = vpop.f32.mrb[8].mxu1 }
 0x51b   :  { %v1523_v62 = vrot.slane %v1516_v61, %v1522_v60  ;;  %v2582_v63 = vpop.f32.mrb[9].mxu1 }
 0x51c   :  { %v2044_v63 = vld [vmem:[%s3702_s7 + $0x68] sm:$0xff] }
 0x51d   :  { %v1524_v3 = vadd.f32 %v1523_v62, %v1432_v59  ;;  %v1525_v4 = vadd.f32 %v2571_v57, %v1523_v62  ;;  %v2041_v57 = vld [vmem:[%s3702_s7 + $0x50] sm:$0xff]  ;;  %v2042_v59 = vld [vmem:[%s3702_s7 + $0x58] sm:$0xff]  ;;  %v2043_v62 = vld [vmem:[%s3702_s7 + $0x60] sm:$0xff] }
 0x51e   :  { %v2827_v61 = vpack.c.bf16 %v2042_v59, %v2041_v57 }
 0x51f   :  { %v1534_v6 = vadd.f32 %v2328_v1, %v1525_v4  ;;  %v1533_v7 = vadd.f32 %v2328_v1, %v1524_v3  ;;  %v2830_v1 = vpack.c.bf16 %v2044_v63, %v2043_v62  ;;  %v2045_v3 = vld [vmem:[%s3702_s7 + $0x70] sm:$0xff]  ;;  %v2046_v4 = vld [vmem:[%s3702_s7 + $0x78] sm:$0xff] }
 0x521   :  { %v1536_v8 = vmax.f32 %v1534_v6, 0.0  ;;  %v1535_v9 = vmax.f32 %v1533_v7, 0.0  ;;  %v2833_v6 = vpack.c.bf16 %v2046_v4, %v2045_v3 }
 0x523   :  { %2615 = vmatprep.mubr.f32.mxu1 %v1535_v9 }
 0x524   :  { %2616 = vmatmul.mubr.f32.vlgmr.msra.gmra.mrb[10].mxu1 %v1536_v8 }
 0x525   :  { %2695 = vmatprep.mubr.msk.f32.mxu1 %vm3113_vm3, %v3114_v5  ;;  %2813 = vmatpush3.bf16.msra.mxu1 %v2812_v32 }
 0x526   :  { %2814 = vmatprep.subr.bf16.mxu1 %v3111_v2 }
 0x529   :  { %2816 = vmatpush3.bf16.msra.mxu1 %v2815_v49 }
 0x52a   :  { %2817 = vmatprep.subr.bf16.mxu1 %v3111_v2 }
 0x52d   :  { %2819 = vmatpush3.bf16.msra.mxu1 %v2818_v52 }
 0x52e   :  { %2820 = vmatprep.subr.bf16.mxu1 %v3111_v2 }
 0x5f7   :  { %v2617_v11 = vpop.f32.mrb[10].mxu1 }
 0x5f8   :  { %v1632_v12 = vadd.f32 %v2617_v11, %v2329_v10  ;;  %v1626_v13 = vpop.f32.mrb[11].mxu1 }
 0x5f9   :  { %v1627_v14 = vadd.f32 %v2329_v10, %v1626_v13 }
 0x5fa   :  { %v1636_v18 = vmax.f32 %v1632_v12, 0.0 }
 0x5fb   :  { %v1635_v20 = vmax.f32 %v1627_v14, 0.0 }
 0x5fd   :  { %v2791_v23 = vpack.c.bf16 %v1636_v18, %v1635_v20 }
 0x5ff   :  { %2792 = vmatpush3.bf16.msra.mxu0 %v2791_v23 }
 0x600   :  { %2793 = vmatprep.subr.bf16.mxu0 %v3111_v2 }
 0x602   :  { %2623 = vmatmul.mubr.msk.f32.vlgmr.msra.gmra.mrb[14].mxu0 %vm1637_vm15, %v2295_v24 }
 0x603   :  { %2795 = vmatpush3.bf16.msra.mxu0 %v2794_v25  ;;  %2633 = vmatprep.mubr.msk.f32.mxu0 %vm3113_vm3, %v3114_v5 }
 0x604   :  { %2796 = vmatprep.subr.bf16.mxu0 %v3111_v2 }
 0x607   :  { %2798 = vmatpush3.bf16.msra.mxu0 %v2797_v28 }
 0x608   :  { %2636 = vmatprep.subr.mxu0 %v3114_v5 }
 0x6d5   :  { %v1707_v35 = vpop.f32.mrb[14].mxu0 }
 0x6d6   :  { %v2624_v36 = vpop.f32.mrb[15].mxu0  ;;  %2634 = vmatmul.mubr.msk.f32.vlgmr.msra.gmra.mrb[16].mxu0 %vm463_vm10, %v1707_v35 }
 0x6d7   :  { %2637 = vmatpush3.msk.msra.mxu0 %vm1193_vm11, %v1711_v16  ;;  %2638 = vmatprep.mubr.msk.f32.mxu0 %vm3113_vm3, %v3114_v5 }
 0x6d8   :  { %2799 = vmatprep.subr.bf16.mxu0 %v3111_v2 }
 0x6da   :  { %2639 = vmatmul.mubr.msk.f32.vlgmr.msra.gmra.mrb[18].mxu0 %vm1186_vm13, %v3423_v19  ;;  %v1945_v19 = vld [vmem:[%s3706_s16 + $0x10] sm:$0xff] }
 0x6db   :  { %2801 = vmatpush3.bf16.msra.mxu0 %v2800_v37  ;;  %2649 = vmatprep.mubr.msk.f32.mxu0 %vm3113_vm3, %v3114_v5  ;;  %v2809_v34 = vpack.c.bf16 %v1946_v47, %v1945_v19 }
 0x6dc   :  { %2802 = vmatprep.subr.bf16.mxu0 %v3111_v2 }
 0x6df   :  { %2804 = vmatpush3.bf16.msra.mxu0 %v2803_v41 }
 0x6e0   :  { %2805 = vmatprep.subr.bf16.mxu0 %v3111_v2 }
 0x6e2   :  { %2650 = vmatmul.mubr.msk.f32.vlgmr.msra.gmra.mrb[20].mxu0 %vm463_vm10, %v988_v46 }
 0x6e3   :  { %2807 = vmatpush3.bf16.msra.mxu0 %v2806_v45  ;;  %2660 = vmatprep.mubr.msk.f32.mxu0 %vm3113_vm3, %v3114_v5  ;;  %v2037_v5 = vld [vmem:[%s3702_s7 + $0x30] sm:$0xff] }
 0x6e4   :  { %2808 = vmatprep.subr.bf16.mxu0 %v3111_v2  ;;  %v2821_v54 = vpack.c.bf16 %v2038_v53, %v2037_v5 }
 0x6e6   :  { %2822 = vmatpush3.bf16.msra.mxu1 %v2821_v54 }
 0x6e7   :  { %2810 = vmatpush3.bf16.msra.mxu0 %v2809_v34  ;;  %2823 = vmatprep.subr.bf16.mxu1 %v3111_v2 }
 0x6ea   :  { %2661 = vmatmul.mubr.msk.f32.vlgmr.msra.gmra.mrb[22].mxu0 %vm463_vm10, %v3506_v33  ;;  %v2039_v33 = vld [vmem:[%s3702_s7 + $0x40] sm:$0xff] }
 0x6eb   :  { %v2824_v56 = vpack.c.bf16 %v2040_v55, %v2039_v33 }
 0x6ed   :  { %2825 = vmatpush3.bf16.msra.mxu1 %v2824_v56 }
 0x6ee   :  { %2826 = vmatprep.subr.bf16.mxu1 %v3111_v2 }
 0x6f1   :  { %2828 = vmatpush3.bf16.msra.mxu1 %v2827_v61 }
 0x6f2   :  { %2829 = vmatprep.subr.bf16.mxu1 %v3111_v2 }
 0x6f5   :  { %2831 = vmatpush3.bf16.msra.mxu1 %v2830_v1 }
 0x6f6   :  { %2832 = vmatprep.subr.bf16.mxu1 %v3111_v2 }
 0x6f9   :  { %2834 = vmatpush3.bf16.msra.mxu1 %v2833_v6 }
 0x7a9   :  { %v1785_v7 = vpop.f32.mrb[16].mxu0 }
 0x7aa   :  { %v2635_v8 = vpop.f32.mrb[17].mxu0 }
 0x7ad   :  { %v1861_v9 = vpop.f32.mrb[18].mxu0 }
 0x7ae   :  { %v1862_v10 = vadd.f32 %v1861_v9, %v1785_v7  ;;  %v2640_v11 = vpop.f32.mrb[19].mxu0 }
 0x7b5   :  { %v1938_v12 = vpop.f32.mrb[20].mxu0 }
 0x7b6   :  { %v1942_v13 = vadd.f32 %v1938_v12, %v1862_v10  ;;  %v2651_v14 = vpop.f32.mrb[21].mxu0 }
 0x7bd   :  { %v2013_v17 = vpop.f32.mrb[22].mxu0 }
 0x7be   :  { %v2020_v18 = vrot.slane %v2013_v17, %v1522_v60  ;;  %v2662_v20 = vpop.f32.mrb[23].mxu0 }
 0x7c0   :  { %v2021_v2 = vadd.f32 %v2020_v18, %v1942_v13 }
 0x7c2   :  { %v2029_v22 = vadd.f32 %v2336_v21, %v2021_v2 }
 0x7c4   :  { %v2030_v23 = vmax.f32 %v2029_v22, 0.0 }
 0x7c6   :  { %2696 = vmatmul.mubr.f32.vlgmr.msra.gmra.mrb[12].mxu1 %v2030_v23 }
 0x7c7   :  { %2919 = shalt.err (!%p2916_p4)
}
 0x7c8   :  { %s3708_s2 = sld [smem:[#allocation39_spill]] }
 0x7ce   :  { %s2920_s0 = scalar_lea.hbm %s3708_s2, 128 }
 0x7cf   :  { %p2921_p5 = scmp.ne.s32.totalorder %s3708_s2, %s2920_s0  ;;  %p2924_p6 = scmp.lt.u32.totalorder %s2920_s0, %s3708_s2 }
 0x7d1   :  { %p2926_p7 = pnand %p2924_p6, %p2921_p5 }
 0x7d3   :  { %2929 = shalt.err (!%p2926_p7)
}
 0x7d4   :  { %2169 = dma.vmem_to_hbm [thread:$0]  %s2167_s23, 128, %s3708_s2, [#allocation5]  }
 0x7d5   :  { %s2930_s5 = scalar_lea.vmem %s3602_s28, 256  ;;  %p2935_p9 = scmp.lt.s32.totalorder %s3602_s28, %s3602_s28 }
 0x7d6   :  { %p2931_p8 = scmp.ne.s32.totalorder %s3602_s28, %s2930_s5  ;;  %p2936_p10 = scmp.lt.s32.totalorder %s2930_s5, %s2930_s5 }
 0x7d8   :  { %p2937_p11 = por %p2936_p10, %p2935_p9 }
 0x7da   :  { %p2938_p12 = pnand %p2937_p11, %p2931_p8 }
 0x7dc   :  { %2941 = shalt.err (!%p2938_p12)
}
 0x7dd   :  { %s2942_s9 = scalar_lea.hbm %s3325_s25, 256 }
 0x7de   :  { %p2943_p13 = scmp.ne.s32.totalorder %s3325_s25, %s2942_s9  ;;  %p2946_p0 = scmp.lt.u32.totalorder %s2942_s9, %s3325_s25 }
 0x7e0   :  { %p2948_p1 = pnand %p2946_p0, %p2943_p13 }
 0x7e2   :  { %2951 = shalt.err (!%p2948_p1)
}
 0x7e3   :  { %s3120_s13 = smov 128   ;;  %s3121_s17 = smov 8  }
 0x7e4   :  { %2191 = dma.vmem_to_hbm [thread:$0]  %s3602_s28, 256, %s3325_s25, [#allocation8], %s3120_s13, %s3120_s13, %s3121_s17  }
 0x7e5   :  { %s3122_s21 = smov [#allocation10]  }
 0x7e6   :  { %s2210_s8 = sshll.u32 %s3122_s21, 4  ;;  %s2211_s8 = int_to_ptr.vmem [resolvable:$true] %s2210_s8 }
 0x7e7   :  { %s2952_s14 = scalar_lea.vmem %s2211_s8, 16  ;;  %s2956_s19 = scalar_lea.vmem %s2211_s8, 32 }
 0x7e8   :  { %p2953_p2 = scmp.ne.s32.totalorder %s2211_s8, %s2952_s14  ;;  %p2957_p3 = scmp.lt.s32.totalorder %s2211_s8, %s2211_s8 }
 0x7e9   :  { %p2958_p4 = scmp.lt.s32.totalorder %s2956_s19, %s2952_s14 }
 0x7eb   :  { %p2959_p5 = por %p2958_p4, %p2957_p3 }
 0x7ed   :  { %p2960_p6 = pnand %p2959_p5, %p2953_p2 }
 0x7ef   :  { %2963 = shalt.err (!%p2960_p6)
}
 0x7f0   :  { %s2964_s24 = scalar_lea.hbm %s3335_s3, 16 }
 0x7f1   :  { %p2965_p7 = scmp.ne.s32.totalorder %s3335_s3, %s2964_s24  ;;  %p2968_p8 = scmp.lt.u32.totalorder %s2964_s24, %s3335_s3 }
 0x7f3   :  { %p2970_p9 = pnand %p2968_p8, %p2965_p7 }
 0x7f5   :  { %2973 = shalt.err (!%p2970_p9)
}
 0x7f6   :  { %2213 = dma.vmem_to_hbm [thread:$0]  %s2211_s8, 16, %s3335_s3, [#allocation11]  }
 0x7f7   :  { %s3123_s25 = smov [#allocation6]   ;;  %s3124_s6 = smov [#allocation9]  }
 0x7f8   :  { %s2176_s30 = sshll.u32 %s3123_s25, 4  ;;  %s2197_s20 = sshll.u32 %s3124_s6, 4  ;;  %s2177_s30 = int_to_ptr.vmem [resolvable:$true] %s2176_s30  ;;  %s3624_s20 = int_to_ptr.vmem [resolvable:$true] %s2197_s20 }
 0x7f9   :  { %s2974_s27 = scalar_lea.vmem %s2177_s30, 128  ;;  %p2979_p11 = scmp.lt.s32.totalorder %s2177_s30, %s2177_s30 }
 0x7fa   :  { %p2975_p10 = scmp.ne.s32.totalorder %s2177_s30, %s2974_s27  ;;  %p2980_p12 = scmp.lt.s32.totalorder %s2974_s27, %s2974_s27 }
 0x7fc   :  { %p2981_p13 = por %p2980_p12, %p2979_p11 }
 0x7fe   :  { %p2982_p0 = pnand %p2981_p13, %p2975_p10 }
 0x800   :  { %2985 = shalt.err (!%p2982_p0)
}
 0x801   :  { %s3709_s4 = sld [smem:[#allocation40_spill]] }
 0x807   :  { %s2986_s7 = scalar_lea.hbm %s3709_s4, 128 }
 0x808   :  { %p2987_p1 = scmp.ne.s32.totalorder %s3709_s4, %s2986_s7  ;;  %p2990_p2 = scmp.lt.u32.totalorder %s2986_s7, %s3709_s4 }
 0x80a   :  { %p2992_p3 = pnand %p2990_p2, %p2987_p1 }
 0x80c   :  { %2995 = shalt.err (!%p2992_p3)
}
 0x80d   :  { %2179 = dma.vmem_to_hbm [thread:$0]  %s2177_s30, 128, %s3709_s4, [#allocation5]  }
 0x80e   :  { %s2996_s3 = scalar_lea.vmem %s3624_s20, 256  ;;  %p3001_p5 = scmp.lt.s32.totalorder %s3624_s20, %s3624_s20 }
 0x80f   :  { %p2997_p4 = scmp.ne.s32.totalorder %s3624_s20, %s2996_s3  ;;  %p3002_p6 = scmp.lt.s32.totalorder %s2996_s3, %s2996_s3 }
 0x811   :  { %p3003_p7 = por %p3002_p6, %p3001_p5 }
 0x813   :  { %p3004_p8 = pnand %p3003_p7, %p2997_p4 }
 0x815   :  { %3007 = shalt.err (!%p3004_p8)
}
 0x816   :  { %s3008_s10 = scalar_lea.hbm %s3330_s12, 256 }
 0x817   :  { %p3009_p9 = scmp.ne.s32.totalorder %s3330_s12, %s3008_s10  ;;  %p3012_p10 = scmp.lt.u32.totalorder %s3008_s10, %s3330_s12 }
 0x819   :  { %p3014_p11 = pnand %p3012_p10, %p3009_p9 }
 0x81b   :  { %3017 = shalt.err (!%p3014_p11)
}
 0x81c   :  { %2203 = dma.vmem_to_hbm [thread:$0]  %s3624_s20, 256, %s3330_s12, [#allocation8], %s3120_s13, %s3120_s13, %s3121_s17  }
 0x81d   :  { %s3125_s11 = smov [#allocation12]  }
 0x81e   :  { %s2220_s15 = sshll.u32 %s3125_s11, 4  ;;  %s2221_s15 = int_to_ptr.vmem [resolvable:$true] %s2220_s15 }
 0x81f   :  { %s3018_s16 = scalar_lea.vmem %s2221_s15, 16  ;;  %s3022_s18 = scalar_lea.vmem %s2221_s15, 32 }
 0x820   :  { %p3019_p12 = scmp.ne.s32.totalorder %s2221_s15, %s3018_s16  ;;  %p3023_p13 = scmp.lt.s32.totalorder %s2221_s15, %s2221_s15 }
 0x821   :  { %p3024_p0 = scmp.lt.s32.totalorder %s3022_s18, %s3018_s16 }
 0x823   :  { %p3025_p1 = por %p3024_p0, %p3023_p13 }
 0x825   :  { %p3026_p2 = pnand %p3025_p1, %p3019_p12 }
 0x827   :  { %3029 = shalt.err (!%p3026_p2)
}
 0x828   :  { %s3030_s22 = scalar_lea.hbm %s3340_s29, 16 }
 0x829   :  { %p3031_p3 = scmp.ne.s32.totalorder %s3340_s29, %s3030_s22  ;;  %p3034_p4 = scmp.lt.u32.totalorder %s3030_s22, %s3340_s29 }
 0x82b   :  { %p3036_p5 = pnand %p3034_p4, %p3031_p3 }
 0x82d   :  { %3039 = shalt.err (!%p3036_p5)
}
 0x82e   :  { %s3710_s12 = sld [smem:[#allocation37_spill]]  ;;  %s3126_s23 = smov [#allocation2]  }
 0x82f   :  { %2223 = dma.vmem_to_hbm [thread:$0]  %s2221_s15, 16, %s3340_s29, [#allocation11]  }
 0x830   :  { %s2156_s26 = sshll.u32 %s3126_s23, 4  ;;  %s2157_s26 = int_to_ptr.vmem [resolvable:$true] %s2156_s26 }
 0x831   :  { %s3040_s28 = scalar_lea.vmem %s2157_s26, 128  ;;  %p3045_p7 = scmp.lt.s32.totalorder %s2157_s26, %s2157_s26 }
 0x832   :  { %p3041_p6 = scmp.ne.s32.totalorder %s2157_s26, %s3040_s28  ;;  %p3046_p8 = scmp.lt.s32.totalorder %s3040_s28, %s3040_s28 }
 0x834   :  { %v2337_v0 = vld [vmem:[%s3710_s12] ss:$0 sm:$0xff]  ;;  %p3047_p9 = por %p3046_p8, %p3045_p7 }
 0x836   :  { %p3048_p10 = pnand %p3047_p9, %p3041_p6 }
 0x899   :  { %v2120_v60 = vpop.f32.mrb[12].mxu1 }
 0x89a   :  { %v2121_v24 = vadd.f32 %v2337_v0, %v2120_v60  ;;  %v2697_v25 = vpop.f32.mrb[13].mxu1 }
 0x89c   :  { %2124 = vst.msk [vmem:[#allocation2] sm:$0xff] %vm1186_vm13, %v2121_v24 }
 0x89d   :  { %3051 = shalt.err (!%p3048_p10)
}
 0x89e   :  { %s3711_s1 = sld [smem:[#allocation38_spill]] }
 0x8a4   :  { %s3052_s29 = scalar_lea.hbm %s3711_s1, 128 }
 0x8a5   :  { %p3053_p11 = scmp.ne.s32.totalorder %s3711_s1, %s3052_s29  ;;  %p3056_p12 = scmp.lt.u32.totalorder %s3052_s29, %s3711_s1 }
 0x8a7   :  { %p3058_p13 = pnand %p3056_p12, %p3053_p11 }
 0x8a9   :  { %3061 = shalt.err (!%p3058_p13)
}
 0x8aa   :  { %2159 = dma.vmem_to_hbm [thread:$0]  %s2157_s26, 128, %s3711_s1, [#allocation3]  }
 0x8ab   :  { %3062 = dma.done.wait [#allocation3], 128  }
 0x8ac   :  { %3063 = vsyncadd [#allocation3], 4294967168 }
 0x8ad   :  { %3064 = dma.done.wait [#allocation5], 256  }
 0x8ae   :  { %3065 = vsyncadd [#allocation5], 4294967040 }
 0x8af   :  { %3066 = dma.done.wait [#allocation8], 512  }
 0x8b0   :  { %3067 = vsyncadd [#allocation8], 4294966784 }
 0x8b1   :  { %3068 = dma.done.wait [#allocation11], 32  }
 0x8b2   :  { %3069 = vsyncadd [#allocation11], 4294967264 }
 0x8b3   :  { %2245 = vsyncpa [#allocation3], 1 }
 0x8b4   :  { %2246 = vsyncpa [#allocation5], 1 }
 0x8b5   :  { %2247 = vsyncpa [#allocation8], 1 }
 0x8b6   :  { %2248 = vsyncpa [#allocation11], 1 }

</bundles_post_ra>
